<compile_context>
chip_gen: v7x
topology: tpu7x:2x2x1
jax: 0.10.0
libtpu: 0.0.40
codegen_flags: <defaults>
</compile_context>

<pallas_src>
import math
import functools

import jax
import jax.numpy as jnp
from jax import lax
from jax.experimental import pallas as pl
from jax.experimental.pallas import tpu as pltpu


def _cross_attention_kernel(x_ref, y_ref,
                            wq_ref, bq_ref,
                            wk_ref, bk_ref,
                            wv_ref, bv_ref,
                            wo_ref, bo_ref,
                            o_ref,
                            *, n_heads: int, d_head: int):
    x = x_ref[0]            # (TQ,  d_embed)  bf16
    y = y_ref[0]            # (S_kv, d_cross) bf16
    tq = x.shape[0]
    d_embed = o_ref.shape[-1]
    scale = 1.0 / math.sqrt(d_head)

    out_acc = jnp.zeros((tq, d_embed), jnp.float32)

    # Static (unrolled) loop over heads. All matmuls feed bf16 operands to the MXU
    # and accumulate in f32; softmax / elementwise stays in f32 (v5e-safe).
    # TODO(synk): for very long key/value sequences, tile S_kv and use an online
    # (running max/sum) softmax instead of materializing the (TQ, S_kv) scores.
    for h in range(n_heads):
        q_h = jnp.dot(x, wq_ref[h], preferred_element_type=jnp.float32) + bq_ref[h]  # (TQ, dh)
        k_h = jnp.dot(y, wk_ref[h], preferred_element_type=jnp.float32) + bk_ref[h]  # (Skv, dh)
        v_h = jnp.dot(y, wv_ref[h], preferred_element_type=jnp.float32) + bv_ref[h]  # (Skv, dh)

        # scores = q_h @ k_h^T / sqrt(d_head); softmax along the key (lane) axis.
        s = lax.dot_general(q_h.astype(jnp.bfloat16), k_h.astype(jnp.bfloat16),
                            dimension_numbers=(((1,), (1,)), ((), ())),
                            preferred_element_type=jnp.float32) * scale              # (TQ, Skv)
        m = jnp.max(s, axis=-1, keepdims=True)
        p = jnp.exp(s - m)
        denom = jnp.sum(p, axis=-1, keepdims=True)
        p = p * pl.reciprocal(denom, approx=True)   # EUP vrcp, off the VALU critical path

        o_h = jnp.dot(p.astype(jnp.bfloat16), v_h.astype(jnp.bfloat16),
                      preferred_element_type=jnp.float32)                            # (TQ, dh)

        # Output projection folded into the head loop: out += o_h @ Wo[h].
        out_acc = out_acc + jnp.dot(o_h.astype(jnp.bfloat16), wo_ref[h],
                                    preferred_element_type=jnp.float32)              # (TQ, d_embed)

    o_ref[0] = (out_acc + bo_ref[...]).astype(o_ref.dtype)


def _pick_q_tile(s_q: int) -> int:
    # Lane/MXU-friendly query tiles; fall back to the whole (small) sequence.
    for t in (256, 128):
        if s_q % t == 0:
            return t
    return s_q


def _padded_bytes(shape, dtype) -> int:
    """Rough VMEM footprint of one buffer of `shape` with (sublane, lane) padding."""
    shape = tuple(int(d) for d in shape)
    if len(shape) < 2:
        shape = (1,) * (2 - len(shape)) + shape
    *lead, r, c = shape
    itemsize = jnp.dtype(dtype).itemsize
    sub = 8 * max(1, 4 // itemsize)
    r_p = -(-r // sub) * sub
    c_p = -(-c // 128) * 128
    n = 1
    for d in lead:
        n *= d
    return n * r_p * c_p * itemsize


def cross_attention(x, y, params, n_heads):
    """x: (B, S_q, d_embed), y: (B, S_kv, d_cross). Returns (B, S_q, d_embed)."""
    b, s_q, d_embed = x.shape
    _, s_kv, d_cross = y.shape
    assert d_embed % n_heads == 0
    d_head = d_embed // n_heads
    wq, bq, wk, bk, wv, bv, wo, bo = params

    bf16 = jnp.bfloat16
    # Head-major weight / bias layout (wrapper-side layout plumbing): the kernel
    # only ever slices the leading head axis.
    wq_h = wq.reshape(d_embed, n_heads, d_head).transpose(1, 0, 2).astype(bf16)
    wk_h = wk.reshape(d_cross, n_heads, d_head).transpose(1, 0, 2).astype(bf16)
    wv_h = wv.reshape(d_cross, n_heads, d_head).transpose(1, 0, 2).astype(bf16)
    wo_h = wo.reshape(n_heads, d_head, d_embed).astype(bf16)
    bq_h = bq.reshape(n_heads, 1, d_head).astype(jnp.float32)
    bk_h = bk.reshape(n_heads, 1, d_head).astype(jnp.float32)
    bv_h = bv.reshape(n_heads, 1, d_head).astype(jnp.float32)
    bo_2d = bo.reshape(1, d_embed).astype(jnp.float32)

    # bf16 activations into the kernel: halves HBM traffic, native MXU input dtype.
    x_bf = x.astype(bf16)
    y_bf = y.astype(bf16)

    tq = _pick_q_tile(s_q)
    grid = (b, s_q // tq)

    # VMEM budget from the actual block sizes (+ rough in-kernel intermediates),
    # clamped so it never exceeds v7x's 64 MiB physical VMEM.
    weight_args = (wq_h, bq_h, wk_h, bk_h, wv_h, bv_h, wo_h, bo_2d)
    est = 2 * _padded_bytes((tq, d_embed), bf16)          # x tile (double-buffered)
    est += 2 * _padded_bytes((s_kv, d_cross), bf16)       # y tile
    est += 2 * _padded_bytes((tq, d_embed), x.dtype)      # out tile
    est += sum(_padded_bytes(a.shape, a.dtype) for a in weight_args)  # weights (1 buf)
    est += _padded_bytes((tq, s_kv), jnp.float32)         # per-head scores
    est += 2 * _padded_bytes((tq, d_embed), jnp.float32)  # accumulator / epilogue
    vmem_limit = int(min(max(2 * est, 32 << 20), 64 << 20))

    kernel = functools.partial(_cross_attention_kernel, n_heads=n_heads, d_head=d_head)

    def build(single_buffer_weights: bool):
        def const_spec(shape):
            if single_buffer_weights:
                return pl.BlockSpec(shape, lambda bi, qi: (0,) * len(shape),
                                    pipeline_mode=pl.Buffered(1))
            return pl.BlockSpec(shape, lambda bi, qi: (0,) * len(shape))

        return pl.pallas_call(
            kernel,
            out_shape=jax.ShapeDtypeStruct((b, s_q, d_embed), x.dtype),
            grid_spec=pltpu.PrefetchScalarGridSpec(
                num_scalar_prefetch=0,
                grid=grid,
                in_specs=[
                    pl.BlockSpec((1, tq, d_embed), lambda bi, qi: (bi, qi, 0)),   # x
                    pl.BlockSpec((1, s_kv, d_cross), lambda bi, qi: (bi, 0, 0)),  # y
                    const_spec((n_heads, d_embed, d_head)),  # wq (head-major)
                    const_spec((n_heads, 1, d_head)),        # bq
                    const_spec((n_heads, d_cross, d_head)),  # wk
                    const_spec((n_heads, 1, d_head)),        # bk
                    const_spec((n_heads, d_cross, d_head)),  # wv
                    const_spec((n_heads, 1, d_head)),        # bv
                    const_spec((n_heads, d_head, d_embed)),  # wo (head-major rows)
                    const_spec((1, d_embed)),                # bo
                ],
                out_specs=pl.BlockSpec((1, tq, d_embed), lambda bi, qi: (bi, qi, 0)),
            ),
            compiler_params=pltpu.CompilerParams(
                dimension_semantics=("parallel", "parallel"),
                vmem_limit_bytes=vmem_limit,
            ),
        )

    args = (x_bf, y_bf, wq_h, bq_h, wk_h, bk_h, wv_h, bv_h, wo_h, bo_2d)
    try:
        return build(True)(*args)
    except Exception:
        # pipeline_mode=pl.Buffered(1) not honored by this jax/pallas build:
        # fall back to default (double-buffered) weight blocks — same semantics.
        return build(False)(*args)


def cross_attention_ref(x, y, params, n_heads):
    """Pure-JAX f32 reference mirroring the PyTorch forward."""
    wq, bq, wk, bk, wv, bv, wo, bo = params
    b, s_q, d_embed = x.shape
    d_head = d_embed // n_heads
    q = x @ wq + bq
    k = y @ wk + bk
    v = y @ wv + bv
    q = q.reshape(b, s_q, n_heads, d_head).transpose(0, 2, 1, 3)
    k = k.reshape(b, -1, n_heads, d_head).transpose(0, 2, 1, 3)
    v = v.reshape(b, -1, n_heads, d_head).transpose(0, 2, 1, 3)
    w = jnp.einsum('bhqd,bhkd->bhqk', q, k) / math.sqrt(d_head)
    w = jax.nn.softmax(w, axis=-1)
    o = jnp.einsum('bhqk,bhkd->bhqd', w, v)
    o = o.transpose(0, 2, 1, 3).reshape(b, s_q, d_embed)
    return o @ wo + bo


def make_params(key, d_embed, d_cross):
    """Deterministic init matching nn.Linear shapes (stored as (in, out))."""
    ks = jax.random.split(key, 8)

    def lin(kw, kb, d_in, d_out):
        bound = 1.0 / math.sqrt(d_in)
        w = jax.random.uniform(kw, (d_in, d_out), jnp.float32, -bound, bound)
        b = jax.random.uniform(kb, (1, d_out), jnp.float32, -bound, bound)
        return w, b

    wq, bq = lin(ks[0], ks[1], d_embed, d_embed)
    wk, bk = lin(ks[2], ks[3], d_cross, d_embed)
    wv, bv = lin(ks[4], ks[5], d_cross, d_embed)
    wo, bo = lin(ks[6], ks[7], d_embed, d_embed)
    return (wq, bq, wk, bk, wv, bv, wo, bo)


if __name__ == "__main__":
    n_heads = 4
    d_embed = 32      # d_head = 8
    d_cross = 24
    batch = 2
    seq_q = 16
    seq_kv = 8

    key = jax.random.PRNGKey(0)
    kx, ky, kp = jax.random.split(key, 3)
    x = jax.random.normal(kx, (batch, seq_q, d_embed), jnp.float32)
    y = jax.random.normal(ky, (batch, seq_kv, d_cross), jnp.float32)
    params = make_params(kp, d_embed, d_cross)

    out = cross_attention(x, y, params, n_heads)
    out = jax.block_until_ready(out)

    ref = cross_attention_ref(x, y, params, n_heads)
    assert out.shape == (batch, seq_q, d_embed)
    max_err = float(jnp.max(jnp.abs(out - ref)))
    # bf16 MXU operands -> loosened tolerance vs the f32 reference.
    assert jnp.allclose(out, ref, atol=5e-2, rtol=5e-2), f"mismatch vs reference (max_err={max_err})"

    print("KERNEL_OK")
</pallas_src>

<mosaic_0001>
module attributes {stable_mosaic.version = 11 : i64} {
  func.func @_cross_attention_kernel(%arg0: i32, %arg1: i32, %arg2: memref<1x16x32xbf16, #tpu.memory_space<vmem>>, %arg3: memref<1x8x24xbf16, #tpu.memory_space<vmem>>, %arg4: memref<4x32x8xbf16, #tpu.memory_space<vmem>>, %arg5: memref<4x1x8xf32, #tpu.memory_space<vmem>>, %arg6: memref<4x24x8xbf16, #tpu.memory_space<vmem>>, %arg7: memref<4x1x8xf32, #tpu.memory_space<vmem>>, %arg8: memref<4x24x8xbf16, #tpu.memory_space<vmem>>, %arg9: memref<4x1x8xf32, #tpu.memory_space<vmem>>, %arg10: memref<4x8x32xbf16, #tpu.memory_space<vmem>>, %arg11: memref<1x32xf32, #tpu.memory_space<vmem>>, %arg12: memref<1x16x32xf32, #tpu.memory_space<vmem>>) attributes {dimension_semantics = [#tpu.dimension_semantics<parallel>, #tpu.dimension_semantics<parallel>], iteration_bounds = array<i64: 2, 1>, scalar_prefetch = 0 : i64, scratch_operands = 0 : i64, tpu.core_type = #tpu.core_type<tc>, window_params = [{transform_indices = @transform_0, window_bounds = array<i64: 1, 16, 32>}, {transform_indices = @transform_1, window_bounds = array<i64: 1, 8, 24>}, {pipeline_mode = #tpu.pipeline_mode<synchronous>, transform_indices = @transform_2, window_bounds = array<i64: 4, 32, 8>}, {pipeline_mode = #tpu.pipeline_mode<synchronous>, transform_indices = @transform_3, window_bounds = array<i64: 4, 1, 8>}, {pipeline_mode = #tpu.pipeline_mode<synchronous>, transform_indices = @transform_4, window_bounds = array<i64: 4, 24, 8>}, {pipeline_mode = #tpu.pipeline_mode<synchronous>, transform_indices = @transform_5, window_bounds = array<i64: 4, 1, 8>}, {pipeline_mode = #tpu.pipeline_mode<synchronous>, transform_indices = @transform_6, window_bounds = array<i64: 4, 24, 8>}, {pipeline_mode = #tpu.pipeline_mode<synchronous>, transform_indices = @transform_7, window_bounds = array<i64: 4, 1, 8>}, {pipeline_mode = #tpu.pipeline_mode<synchronous>, transform_indices = @transform_8, window_bounds = array<i64: 4, 8, 32>}, {pipeline_mode = #tpu.pipeline_mode<synchronous>, transform_indices = @transform_9, window_bounds = array<i64: 1, 32>}, {transform_indices = @transform_10, window_bounds = array<i64: 1, 16, 32>}]} {
    %c0 = arith.constant 0 : index
    %c0_0 = arith.constant 0 : index
    %c0_1 = arith.constant 0 : index
    %0 = vector.load %arg2[%c0, %c0_0, %c0_1] : memref<1x16x32xbf16, #tpu.memory_space<vmem>>, vector<1x16x32xbf16>
    %1 = vector.shape_cast %0 : vector<1x16x32xbf16> to vector<16x32xbf16>
    %c0_2 = arith.constant 0 : index
    %c0_3 = arith.constant 0 : index
    %c0_4 = arith.constant 0 : index
    %2 = vector.load %arg3[%c0_2, %c0_3, %c0_4] : memref<1x8x24xbf16, #tpu.memory_space<vmem>>, vector<1x8x24xbf16>
    %3 = vector.shape_cast %2 : vector<1x8x24xbf16> to vector<8x24xbf16>
    %cst = arith.constant 0.000000e+00 : f32
    %4 = vector.broadcast %cst : f32 to vector<16x32xf32>
    %c0_5 = arith.constant 0 : index
    %c0_6 = arith.constant 0 : index
    %c0_7 = arith.constant 0 : index
    %5 = vector.load %arg4[%c0_5, %c0_6, %c0_7] : memref<4x32x8xbf16, #tpu.memory_space<vmem>>, vector<1x32x8xbf16>
    %6 = vector.shape_cast %5 : vector<1x32x8xbf16> to vector<32x8xbf16>
    %cst_8 = arith.constant dense<0.000000e+00> : vector<16x8xf32>
    %7 = tpu.matmul %1, %6, %cst_8 {dimension_numbers = #tpu.dot_dimension_numbers<[1], [0], [0], [1], [0, 0, 1, 1], [], []>} : vector<16x32xbf16>, vector<32x8xbf16>, vector<16x8xf32> -> vector<16x8xf32>
    %c0_9 = arith.constant 0 : index
    %c0_10 = arith.constant 0 : index
    %c0_11 = arith.constant 0 : index
    %8 = vector.load %arg5[%c0_9, %c0_10, %c0_11] : memref<4x1x8xf32, #tpu.memory_space<vmem>>, vector<1x1x8xf32>
    %9 = vector.shape_cast %8 : vector<1x1x8xf32> to vector<1x8xf32>
    %10 = vector.broadcast %9 : vector<1x8xf32> to vector<16x8xf32>
    %11 = arith.addf %7, %10 : vector<16x8xf32>
    %c0_12 = arith.constant 0 : index
    %c0_13 = arith.constant 0 : index
    %c0_14 = arith.constant 0 : index
    %12 = vector.load %arg6[%c0_12, %c0_13, %c0_14] : memref<4x24x8xbf16, #tpu.memory_space<vmem>>, vector<1x24x8xbf16>
    %13 = vector.shape_cast %12 : vector<1x24x8xbf16> to vector<24x8xbf16>
    %cst_15 = arith.constant dense<0.000000e+00> : vector<8x8xf32>
    %14 = tpu.matmul %3, %13, %cst_15 {dimension_numbers = #tpu.dot_dimension_numbers<[1], [0], [0], [1], [0, 0, 1, 1], [], []>} : vector<8x24xbf16>, vector<24x8xbf16>, vector<8x8xf32> -> vector<8x8xf32>
    %c0_16 = arith.constant 0 : index
    %c0_17 = arith.constant 0 : index
    %c0_18 = arith.constant 0 : index
    %15 = vector.load %arg7[%c0_16, %c0_17, %c0_18] : memref<4x1x8xf32, #tpu.memory_space<vmem>>, vector<1x1x8xf32>
    %16 = vector.shape_cast %15 : vector<1x1x8xf32> to vector<1x8xf32>
    %17 = vector.broadcast %16 : vector<1x8xf32> to vector<8x8xf32>
    %18 = arith.addf %14, %17 : vector<8x8xf32>
    %c0_19 = arith.constant 0 : index
    %c0_20 = arith.constant 0 : index
    %c0_21 = arith.constant 0 : index
    %19 = vector.load %arg8[%c0_19, %c0_20, %c0_21] : memref<4x24x8xbf16, #tpu.memory_space<vmem>>, vector<1x24x8xbf16>
    %20 = vector.shape_cast %19 : vector<1x24x8xbf16> to vector<24x8xbf16>
    %cst_22 = arith.constant dense<0.000000e+00> : vector<8x8xf32>
    %21 = tpu.matmul %3, %20, %cst_22 {dimension_numbers = #tpu.dot_dimension_numbers<[1], [0], [0], [1], [0, 0, 1, 1], [], []>} : vector<8x24xbf16>, vector<24x8xbf16>, vector<8x8xf32> -> vector<8x8xf32>
    %c0_23 = arith.constant 0 : index
    %c0_24 = arith.constant 0 : index
    %c0_25 = arith.constant 0 : index
    %22 = vector.load %arg9[%c0_23, %c0_24, %c0_25] : memref<4x1x8xf32, #tpu.memory_space<vmem>>, vector<1x1x8xf32>
    %23 = vector.shape_cast %22 : vector<1x1x8xf32> to vector<1x8xf32>
    %24 = vector.broadcast %23 : vector<1x8xf32> to vector<8x8xf32>
    %25 = arith.addf %21, %24 : vector<8x8xf32>
    %26 = arith.truncf %11 : vector<16x8xf32> to vector<16x8xbf16>
    %27 = arith.truncf %18 : vector<8x8xf32> to vector<8x8xbf16>
    %cst_26 = arith.constant dense<0.000000e+00> : vector<16x8xf32>
    %28 = tpu.matmul %26, %27, %cst_26 {dimension_numbers = #tpu.dot_dimension_numbers<[1], [1], [0], [0], [0, 0, 1, 0], [], []>} : vector<16x8xbf16>, vector<8x8xbf16>, vector<16x8xf32> -> vector<16x8xf32>
    %cst_27 = arith.constant 0.353553385 : f32
    %29 = vector.broadcast %cst_27 : f32 to vector<16x8xf32>
    %30 = arith.mulf %28, %29 : vector<16x8xf32>
    %cst_28 = arith.constant dense<0xFF800000> : vector<16xf32>
    %31 = vector.multi_reduction <maximumf>, %30, %cst_28 [1] : vector<16x8xf32> to vector<16xf32>
    %32 = vector.shape_cast %31 : vector<16xf32> to vector<16x1xf32>
    %33 = vector.broadcast %32 : vector<16x1xf32> to vector<16x8xf32>
    %34 = arith.subf %30, %33 : vector<16x8xf32>
    %35 = math.exp %34 : vector<16x8xf32>
    %cst_29 = arith.constant dense<0.000000e+00> : vector<16xf32>
    %36 = vector.multi_reduction <add>, %35, %cst_29 [1] : vector<16x8xf32> to vector<16xf32>
    %37 = vector.shape_cast %36 : vector<16xf32> to vector<16x1xf32>
    %38 = tpu.reciprocal %37 {approx = true} : vector<16x1xf32> -> vector<16x1xf32>
    %39 = vector.broadcast %38 : vector<16x1xf32> to vector<16x8xf32>
    %40 = arith.mulf %35, %39 : vector<16x8xf32>
    %41 = arith.truncf %40 : vector<16x8xf32> to vector<16x8xbf16>
    %42 = arith.truncf %25 : vector<8x8xf32> to vector<8x8xbf16>
    %cst_30 = arith.constant dense<0.000000e+00> : vector<16x8xf32>
    %43 = tpu.matmul %41, %42, %cst_30 {dimension_numbers = #tpu.dot_dimension_numbers<[1], [0], [0], [1], [0, 0, 1, 1], [], []>} : vector<16x8xbf16>, vector<8x8xbf16>, vector<16x8xf32> -> vector<16x8xf32>
    %44 = arith.truncf %43 : vector<16x8xf32> to vector<16x8xbf16>
    %c0_31 = arith.constant 0 : index
    %c0_32 = arith.constant 0 : index
    %c0_33 = arith.constant 0 : index
    %45 = vector.load %arg10[%c0_31, %c0_32, %c0_33] : memref<4x8x32xbf16, #tpu.memory_space<vmem>>, vector<1x8x32xbf16>
    %46 = vector.shape_cast %45 : vector<1x8x32xbf16> to vector<8x32xbf16>
    %cst_34 = arith.constant dense<0.000000e+00> : vector<16x32xf32>
    %47 = tpu.matmul %44, %46, %cst_34 {dimension_numbers = #tpu.dot_dimension_numbers<[1], [0], [0], [1], [0, 0, 1, 1], [], []>} : vector<16x8xbf16>, vector<8x32xbf16>, vector<16x32xf32> -> vector<16x32xf32>
    %48 = arith.addf %4, %47 : vector<16x32xf32>
    %c1 = arith.constant 1 : index
    %c0_35 = arith.constant 0 : index
    %c0_36 = arith.constant 0 : index
    %49 = vector.load %arg4[%c1, %c0_35, %c0_36] : memref<4x32x8xbf16, #tpu.memory_space<vmem>>, vector<1x32x8xbf16>
    %50 = vector.shape_cast %49 : vector<1x32x8xbf16> to vector<32x8xbf16>
    %cst_37 = arith.constant dense<0.000000e+00> : vector<16x8xf32>
    %51 = tpu.matmul %1, %50, %cst_37 {dimension_numbers = #tpu.dot_dimension_numbers<[1], [0], [0], [1], [0, 0, 1, 1], [], []>} : vector<16x32xbf16>, vector<32x8xbf16>, vector<16x8xf32> -> vector<16x8xf32>
    %c1_38 = arith.constant 1 : index
    %c0_39 = arith.constant 0 : index
    %c0_40 = arith.constant 0 : index
    %52 = vector.load %arg5[%c1_38, %c0_39, %c0_40] : memref<4x1x8xf32, #tpu.memory_space<vmem>>, vector<1x1x8xf32>
    %53 = vector.shape_cast %52 : vector<1x1x8xf32> to vector<1x8xf32>
    %54 = vector.broadcast %53 : vector<1x8xf32> to vector<16x8xf32>
    %55 = arith.addf %51, %54 : vector<16x8xf32>
    %c1_41 = arith.constant 1 : index
    %c0_42 = arith.constant 0 : index
    %c0_43 = arith.constant 0 : index
    %56 = vector.load %arg6[%c1_41, %c0_42, %c0_43] : memref<4x24x8xbf16, #tpu.memory_space<vmem>>, vector<1x24x8xbf16>
    %57 = vector.shape_cast %56 : vector<1x24x8xbf16> to vector<24x8xbf16>
    %cst_44 = arith.constant dense<0.000000e+00> : vector<8x8xf32>
    %58 = tpu.matmul %3, %57, %cst_44 {dimension_numbers = #tpu.dot_dimension_numbers<[1], [0], [0], [1], [0, 0, 1, 1], [], []>} : vector<8x24xbf16>, vector<24x8xbf16>, vector<8x8xf32> -> vector<8x8xf32>
    %c1_45 = arith.constant 1 : index
    %c0_46 = arith.constant 0 : index
    %c0_47 = arith.constant 0 : index
    %59 = vector.load %arg7[%c1_45, %c0_46, %c0_47] : memref<4x1x8xf32, #tpu.memory_space<vmem>>, vector<1x1x8xf32>
    %60 = vector.shape_cast %59 : vector<1x1x8xf32> to vector<1x8xf32>
    %61 = vector.broadcast %60 : vector<1x8xf32> to vector<8x8xf32>
    %62 = arith.addf %58, %61 : vector<8x8xf32>
    %c1_48 = arith.constant 1 : index
    %c0_49 = arith.constant 0 : index
    %c0_50 = arith.constant 0 : index
    %63 = vector.load %arg8[%c1_48, %c0_49, %c0_50] : memref<4x24x8xbf16, #tpu.memory_space<vmem>>, vector<1x24x8xbf16>
    %64 = vector.shape_cast %63 : vector<1x24x8xbf16> to vector<24x8xbf16>
    %cst_51 = arith.constant dense<0.000000e+00> : vector<8x8xf32>
    %65 = tpu.matmul %3, %64, %cst_51 {dimension_numbers = #tpu.dot_dimension_numbers<[1], [0], [0], [1], [0, 0, 1, 1], [], []>} : vector<8x24xbf16>, vector<24x8xbf16>, vector<8x8xf32> -> vector<8x8xf32>
    %c1_52 = arith.constant 1 : index
    %c0_53 = arith.constant 0 : index
    %c0_54 = arith.constant 0 : index
    %66 = vector.load %arg9[%c1_52, %c0_53, %c0_54] : memref<4x1x8xf32, #tpu.memory_space<vmem>>, vector<1x1x8xf32>
    %67 = vector.shape_cast %66 : vector<1x1x8xf32> to vector<1x8xf32>
    %68 = vector.broadcast %67 : vector<1x8xf32> to vector<8x8xf32>
    %69 = arith.addf %65, %68 : vector<8x8xf32>
    %70 = arith.truncf %55 : vector<16x8xf32> to vector<16x8xbf16>
    %71 = arith.truncf %62 : vector<8x8xf32> to vector<8x8xbf16>
    %cst_55 = arith.constant dense<0.000000e+00> : vector<16x8xf32>
    %72 = tpu.matmul %70, %71, %cst_55 {dimension_numbers = #tpu.dot_dimension_numbers<[1], [1], [0], [0], [0, 0, 1, 0], [], []>} : vector<16x8xbf16>, vector<8x8xbf16>, vector<16x8xf32> -> vector<16x8xf32>
    %cst_56 = arith.constant 0.353553385 : f32
    %73 = vector.broadcast %cst_56 : f32 to vector<16x8xf32>
    %74 = arith.mulf %72, %73 : vector<16x8xf32>
    %cst_57 = arith.constant dense<0xFF800000> : vector<16xf32>
    %75 = vector.multi_reduction <maximumf>, %74, %cst_57 [1] : vector<16x8xf32> to vector<16xf32>
    %76 = vector.shape_cast %75 : vector<16xf32> to vector<16x1xf32>
    %77 = vector.broadcast %76 : vector<16x1xf32> to vector<16x8xf32>
    %78 = arith.subf %74, %77 : vector<16x8xf32>
    %79 = math.exp %78 : vector<16x8xf32>
    %cst_58 = arith.constant dense<0.000000e+00> : vector<16xf32>
    %80 = vector.multi_reduction <add>, %79, %cst_58 [1] : vector<16x8xf32> to vector<16xf32>
    %81 = vector.shape_cast %80 : vector<16xf32> to vector<16x1xf32>
    %82 = tpu.reciprocal %81 {approx = true} : vector<16x1xf32> -> vector<16x1xf32>
    %83 = vector.broadcast %82 : vector<16x1xf32> to vector<16x8xf32>
    %84 = arith.mulf %79, %83 : vector<16x8xf32>
    %85 = arith.truncf %84 : vector<16x8xf32> to vector<16x8xbf16>
    %86 = arith.truncf %69 : vector<8x8xf32> to vector<8x8xbf16>
    %cst_59 = arith.constant dense<0.000000e+00> : vector<16x8xf32>
    %87 = tpu.matmul %85, %86, %cst_59 {dimension_numbers = #tpu.dot_dimension_numbers<[1], [0], [0], [1], [0, 0, 1, 1], [], []>} : vector<16x8xbf16>, vector<8x8xbf16>, vector<16x8xf32> -> vector<16x8xf32>
    %88 = arith.truncf %87 : vector<16x8xf32> to vector<16x8xbf16>
    %c1_60 = arith.constant 1 : index
    %c0_61 = arith.constant 0 : index
    %c0_62 = arith.constant 0 : index
    %89 = vector.load %arg10[%c1_60, %c0_61, %c0_62] : memref<4x8x32xbf16, #tpu.memory_space<vmem>>, vector<1x8x32xbf16>
    %90 = vector.shape_cast %89 : vector<1x8x32xbf16> to vector<8x32xbf16>
    %cst_63 = arith.constant dense<0.000000e+00> : vector<16x32xf32>
    %91 = tpu.matmul %88, %90, %cst_63 {dimension_numbers = #tpu.dot_dimension_numbers<[1], [0], [0], [1], [0, 0, 1, 1], [], []>} : vector<16x8xbf16>, vector<8x32xbf16>, vector<16x32xf32> -> vector<16x32xf32>
    %92 = arith.addf %48, %91 : vector<16x32xf32>
    %c2 = arith.constant 2 : index
    %c0_64 = arith.constant 0 : index
    %c0_65 = arith.constant 0 : index
    %93 = vector.load %arg4[%c2, %c0_64, %c0_65] : memref<4x32x8xbf16, #tpu.memory_space<vmem>>, vector<1x32x8xbf16>
    %94 = vector.shape_cast %93 : vector<1x32x8xbf16> to vector<32x8xbf16>
    %cst_66 = arith.constant dense<0.000000e+00> : vector<16x8xf32>
    %95 = tpu.matmul %1, %94, %cst_66 {dimension_numbers = #tpu.dot_dimension_numbers<[1], [0], [0], [1], [0, 0, 1, 1], [], []>} : vector<16x32xbf16>, vector<32x8xbf16>, vector<16x8xf32> -> vector<16x8xf32>
    %c2_67 = arith.constant 2 : index
    %c0_68 = arith.constant 0 : index
    %c0_69 = arith.constant 0 : index
    %96 = vector.load %arg5[%c2_67, %c0_68, %c0_69] : memref<4x1x8xf32, #tpu.memory_space<vmem>>, vector<1x1x8xf32>
    %97 = vector.shape_cast %96 : vector<1x1x8xf32> to vector<1x8xf32>
    %98 = vector.broadcast %97 : vector<1x8xf32> to vector<16x8xf32>
    %99 = arith.addf %95, %98 : vector<16x8xf32>
    %c2_70 = arith.constant 2 : index
    %c0_71 = arith.constant 0 : index
    %c0_72 = arith.constant 0 : index
    %100 = vector.load %arg6[%c2_70, %c0_71, %c0_72] : memref<4x24x8xbf16, #tpu.memory_space<vmem>>, vector<1x24x8xbf16>
    %101 = vector.shape_cast %100 : vector<1x24x8xbf16> to vector<24x8xbf16>
    %cst_73 = arith.constant dense<0.000000e+00> : vector<8x8xf32>
    %102 = tpu.matmul %3, %101, %cst_73 {dimension_numbers = #tpu.dot_dimension_numbers<[1], [0], [0], [1], [0, 0, 1, 1], [], []>} : vector<8x24xbf16>, vector<24x8xbf16>, vector<8x8xf32> -> vector<8x8xf32>
    %c2_74 = arith.constant 2 : index
    %c0_75 = arith.constant 0 : index
    %c0_76 = arith.constant 0 : index
    %103 = vector.load %arg7[%c2_74, %c0_75, %c0_76] : memref<4x1x8xf32, #tpu.memory_space<vmem>>, vector<1x1x8xf32>
    %104 = vector.shape_cast %103 : vector<1x1x8xf32> to vector<1x8xf32>
    %105 = vector.broadcast %104 : vector<1x8xf32> to vector<8x8xf32>
    %106 = arith.addf %102, %105 : vector<8x8xf32>
    %c2_77 = arith.constant 2 : index
    %c0_78 = arith.constant 0 : index
    %c0_79 = arith.constant 0 : index
    %107 = vector.load %arg8[%c2_77, %c0_78, %c0_79] : memref<4x24x8xbf16, #tpu.memory_space<vmem>>, vector<1x24x8xbf16>
    %108 = vector.shape_cast %107 : vector<1x24x8xbf16> to vector<24x8xbf16>
    %cst_80 = arith.constant dense<0.000000e+00> : vector<8x8xf32>
    %109 = tpu.matmul %3, %108, %cst_80 {dimension_numbers = #tpu.dot_dimension_numbers<[1], [0], [0], [1], [0, 0, 1, 1], [], []>} : vector<8x24xbf16>, vector<24x8xbf16>, vector<8x8xf32> -> vector<8x8xf32>
    %c2_81 = arith.constant 2 : index
    %c0_82 = arith.constant 0 : index
    %c0_83 = arith.constant 0 : index
    %110 = vector.load %arg9[%c2_81, %c0_82, %c0_83] : memref<4x1x8xf32, #tpu.memory_space<vmem>>, vector<1x1x8xf32>
    %111 = vector.shape_cast %110 : vector<1x1x8xf32> to vector<1x8xf32>
    %112 = vector.broadcast %111 : vector<1x8xf32> to vector<8x8xf32>
    %113 = arith.addf %109, %112 : vector<8x8xf32>
    %114 = arith.truncf %99 : vector<16x8xf32> to vector<16x8xbf16>
    %115 = arith.truncf %106 : vector<8x8xf32> to vector<8x8xbf16>
    %cst_84 = arith.constant dense<0.000000e+00> : vector<16x8xf32>
    %116 = tpu.matmul %114, %115, %cst_84 {dimension_numbers = #tpu.dot_dimension_numbers<[1], [1], [0], [0], [0, 0, 1, 0], [], []>} : vector<16x8xbf16>, vector<8x8xbf16>, vector<16x8xf32> -> vector<16x8xf32>
    %cst_85 = arith.constant 0.353553385 : f32
    %117 = vector.broadcast %cst_85 : f32 to vector<16x8xf32>
    %118 = arith.mulf %116, %117 : vector<16x8xf32>
    %cst_86 = arith.constant dense<0xFF800000> : vector<16xf32>
    %119 = vector.multi_reduction <maximumf>, %118, %cst_86 [1] : vector<16x8xf32> to vector<16xf32>
    %120 = vector.shape_cast %119 : vector<16xf32> to vector<16x1xf32>
    %121 = vector.broadcast %120 : vector<16x1xf32> to vector<16x8xf32>
    %122 = arith.subf %118, %121 : vector<16x8xf32>
    %123 = math.exp %122 : vector<16x8xf32>
    %cst_87 = arith.constant dense<0.000000e+00> : vector<16xf32>
    %124 = vector.multi_reduction <add>, %123, %cst_87 [1] : vector<16x8xf32> to vector<16xf32>
    %125 = vector.shape_cast %124 : vector<16xf32> to vector<16x1xf32>
    %126 = tpu.reciprocal %125 {approx = true} : vector<16x1xf32> -> vector<16x1xf32>
    %127 = vector.broadcast %126 : vector<16x1xf32> to vector<16x8xf32>
    %128 = arith.mulf %123, %127 : vector<16x8xf32>
    %129 = arith.truncf %128 : vector<16x8xf32> to vector<16x8xbf16>
    %130 = arith.truncf %113 : vector<8x8xf32> to vector<8x8xbf16>
    %cst_88 = arith.constant dense<0.000000e+00> : vector<16x8xf32>
    %131 = tpu.matmul %129, %130, %cst_88 {dimension_numbers = #tpu.dot_dimension_numbers<[1], [0], [0], [1], [0, 0, 1, 1], [], []>} : vector<16x8xbf16>, vector<8x8xbf16>, vector<16x8xf32> -> vector<16x8xf32>
    %132 = arith.truncf %131 : vector<16x8xf32> to vector<16x8xbf16>
    %c2_89 = arith.constant 2 : index
    %c0_90 = arith.constant 0 : index
    %c0_91 = arith.constant 0 : index
    %133 = vector.load %arg10[%c2_89, %c0_90, %c0_91] : memref<4x8x32xbf16, #tpu.memory_space<vmem>>, vector<1x8x32xbf16>
    %134 = vector.shape_cast %133 : vector<1x8x32xbf16> to vector<8x32xbf16>
    %cst_92 = arith.constant dense<0.000000e+00> : vector<16x32xf32>
    %135 = tpu.matmul %132, %134, %cst_92 {dimension_numbers = #tpu.dot_dimension_numbers<[1], [0], [0], [1], [0, 0, 1, 1], [], []>} : vector<16x8xbf16>, vector<8x32xbf16>, vector<16x32xf32> -> vector<16x32xf32>
    %136 = arith.addf %92, %135 : vector<16x32xf32>
    %c3 = arith.constant 3 : index
    %c0_93 = arith.constant 0 : index
    %c0_94 = arith.constant 0 : index
    %137 = vector.load %arg4[%c3, %c0_93, %c0_94] : memref<4x32x8xbf16, #tpu.memory_space<vmem>>, vector<1x32x8xbf16>
    %138 = vector.shape_cast %137 : vector<1x32x8xbf16> to vector<32x8xbf16>
    %cst_95 = arith.constant dense<0.000000e+00> : vector<16x8xf32>
    %139 = tpu.matmul %1, %138, %cst_95 {dimension_numbers = #tpu.dot_dimension_numbers<[1], [0], [0], [1], [0, 0, 1, 1], [], []>} : vector<16x32xbf16>, vector<32x8xbf16>, vector<16x8xf32> -> vector<16x8xf32>
    %c3_96 = arith.constant 3 : index
    %c0_97 = arith.constant 0 : index
    %c0_98 = arith.constant 0 : index
    %140 = vector.load %arg5[%c3_96, %c0_97, %c0_98] : memref<4x1x8xf32, #tpu.memory_space<vmem>>, vector<1x1x8xf32>
    %141 = vector.shape_cast %140 : vector<1x1x8xf32> to vector<1x8xf32>
    %142 = vector.broadcast %141 : vector<1x8xf32> to vector<16x8xf32>
    %143 = arith.addf %139, %142 : vector<16x8xf32>
    %c3_99 = arith.constant 3 : index
    %c0_100 = arith.constant 0 : index
    %c0_101 = arith.constant 0 : index
    %144 = vector.load %arg6[%c3_99, %c0_100, %c0_101] : memref<4x24x8xbf16, #tpu.memory_space<vmem>>, vector<1x24x8xbf16>
    %145 = vector.shape_cast %144 : vector<1x24x8xbf16> to vector<24x8xbf16>
    %cst_102 = arith.constant dense<0.000000e+00> : vector<8x8xf32>
    %146 = tpu.matmul %3, %145, %cst_102 {dimension_numbers = #tpu.dot_dimension_numbers<[1], [0], [0], [1], [0, 0, 1, 1], [], []>} : vector<8x24xbf16>, vector<24x8xbf16>, vector<8x8xf32> -> vector<8x8xf32>
    %c3_103 = arith.constant 3 : index
    %c0_104 = arith.constant 0 : index
    %c0_105 = arith.constant 0 : index
    %147 = vector.load %arg7[%c3_103, %c0_104, %c0_105] : memref<4x1x8xf32, #tpu.memory_space<vmem>>, vector<1x1x8xf32>
    %148 = vector.shape_cast %147 : vector<1x1x8xf32> to vector<1x8xf32>
    %149 = vector.broadcast %148 : vector<1x8xf32> to vector<8x8xf32>
    %150 = arith.addf %146, %149 : vector<8x8xf32>
    %c3_106 = arith.constant 3 : index
    %c0_107 = arith.constant 0 : index
    %c0_108 = arith.constant 0 : index
    %151 = vector.load %arg8[%c3_106, %c0_107, %c0_108] : memref<4x24x8xbf16, #tpu.memory_space<vmem>>, vector<1x24x8xbf16>
    %152 = vector.shape_cast %151 : vector<1x24x8xbf16> to vector<24x8xbf16>
    %cst_109 = arith.constant dense<0.000000e+00> : vector<8x8xf32>
    %153 = tpu.matmul %3, %152, %cst_109 {dimension_numbers = #tpu.dot_dimension_numbers<[1], [0], [0], [1], [0, 0, 1, 1], [], []>} : vector<8x24xbf16>, vector<24x8xbf16>, vector<8x8xf32> -> vector<8x8xf32>
    %c3_110 = arith.constant 3 : index
    %c0_111 = arith.constant 0 : index
    %c0_112 = arith.constant 0 : index
    %154 = vector.load %arg9[%c3_110, %c0_111, %c0_112] : memref<4x1x8xf32, #tpu.memory_space<vmem>>, vector<1x1x8xf32>
    %155 = vector.shape_cast %154 : vector<1x1x8xf32> to vector<1x8xf32>
    %156 = vector.broadcast %155 : vector<1x8xf32> to vector<8x8xf32>
    %157 = arith.addf %153, %156 : vector<8x8xf32>
    %158 = arith.truncf %143 : vector<16x8xf32> to vector<16x8xbf16>
    %159 = arith.truncf %150 : vector<8x8xf32> to vector<8x8xbf16>
    %cst_113 = arith.constant dense<0.000000e+00> : vector<16x8xf32>
    %160 = tpu.matmul %158, %159, %cst_113 {dimension_numbers = #tpu.dot_dimension_numbers<[1], [1], [0], [0], [0, 0, 1, 0], [], []>} : vector<16x8xbf16>, vector<8x8xbf16>, vector<16x8xf32> -> vector<16x8xf32>
    %cst_114 = arith.constant 0.353553385 : f32
    %161 = vector.broadcast %cst_114 : f32 to vector<16x8xf32>
    %162 = arith.mulf %160, %161 : vector<16x8xf32>
    %cst_115 = arith.constant dense<0xFF800000> : vector<16xf32>
    %163 = vector.multi_reduction <maximumf>, %162, %cst_115 [1] : vector<16x8xf32> to vector<16xf32>
    %164 = vector.shape_cast %163 : vector<16xf32> to vector<16x1xf32>
    %165 = vector.broadcast %164 : vector<16x1xf32> to vector<16x8xf32>
    %166 = arith.subf %162, %165 : vector<16x8xf32>
    %167 = math.exp %166 : vector<16x8xf32>
    %cst_116 = arith.constant dense<0.000000e+00> : vector<16xf32>
    %168 = vector.multi_reduction <add>, %167, %cst_116 [1] : vector<16x8xf32> to vector<16xf32>
    %169 = vector.shape_cast %168 : vector<16xf32> to vector<16x1xf32>
    %170 = tpu.reciprocal %169 {approx = true} : vector<16x1xf32> -> vector<16x1xf32>
    %171 = vector.broadcast %170 : vector<16x1xf32> to vector<16x8xf32>
    %172 = arith.mulf %167, %171 : vector<16x8xf32>
    %173 = arith.truncf %172 : vector<16x8xf32> to vector<16x8xbf16>
    %174 = arith.truncf %157 : vector<8x8xf32> to vector<8x8xbf16>
    %cst_117 = arith.constant dense<0.000000e+00> : vector<16x8xf32>
    %175 = tpu.matmul %173, %174, %cst_117 {dimension_numbers = #tpu.dot_dimension_numbers<[1], [0], [0], [1], [0, 0, 1, 1], [], []>} : vector<16x8xbf16>, vector<8x8xbf16>, vector<16x8xf32> -> vector<16x8xf32>
    %176 = arith.truncf %175 : vector<16x8xf32> to vector<16x8xbf16>
    %c3_118 = arith.constant 3 : index
    %c0_119 = arith.constant 0 : index
    %c0_120 = arith.constant 0 : index
    %177 = vector.load %arg10[%c3_118, %c0_119, %c0_120] : memref<4x8x32xbf16, #tpu.memory_space<vmem>>, vector<1x8x32xbf16>
    %178 = vector.shape_cast %177 : vector<1x8x32xbf16> to vector<8x32xbf16>
    %cst_121 = arith.constant dense<0.000000e+00> : vector<16x32xf32>
    %179 = tpu.matmul %176, %178, %cst_121 {dimension_numbers = #tpu.dot_dimension_numbers<[1], [0], [0], [1], [0, 0, 1, 1], [], []>} : vector<16x8xbf16>, vector<8x32xbf16>, vector<16x32xf32> -> vector<16x32xf32>
    %180 = arith.addf %136, %179 : vector<16x32xf32>
    %c0_122 = arith.constant 0 : index
    %c0_123 = arith.constant 0 : index
    %181 = vector.load %arg11[%c0_122, %c0_123] : memref<1x32xf32, #tpu.memory_space<vmem>>, vector<1x32xf32>
    %182 = vector.broadcast %181 : vector<1x32xf32> to vector<16x32xf32>
    %183 = arith.addf %180, %182 : vector<16x32xf32>
    %c0_124 = arith.constant 0 : index
    %c0_125 = arith.constant 0 : index
    %c0_126 = arith.constant 0 : index
    %184 = vector.load %arg12[%c0_124, %c0_125, %c0_126] : memref<1x16x32xf32, #tpu.memory_space<vmem>>, vector<1x16x32xf32>
    %185 = vector.shape_cast %184 : vector<1x16x32xf32> to vector<16x32xf32>
    %186 = vector.shape_cast %183 : vector<16x32xf32> to vector<1x16x32xf32>
    tpu.vector_store %arg12[%c0_124, %c0_125, %c0_126], %186 {strides = array<i32>} : memref<1x16x32xf32, #tpu.memory_space<vmem>>, vector<1x16x32xf32>,
    return
  }
  func.func @transform_0(%arg0: i32, %arg1: i32) -> (i32, i32, i32) {
    %c0_i32 = arith.constant 0 : i32
    %c0_i32_0 = arith.constant 0 : i32
    return %arg0, %arg1, %c0_i32 : i32, i32, i32
  }
  func.func @transform_1(%arg0: i32, %arg1: i32) -> (i32, i32, i32) {
    %c0_i32 = arith.constant 0 : i32
    %c0_i32_0 = arith.constant 0 : i32
    %c0_i32_1 = arith.constant 0 : i32
    return %arg0, %c0_i32, %c0_i32_0 : i32, i32, i32
  }
  func.func @transform_2(%arg0: i32, %arg1: i32) -> (i32, i32, i32) {
    %c0_i32 = arith.constant 0 : i32
    %c0_i32_0 = arith.constant 0 : i32
    %c0_i32_1 = arith.constant 0 : i32
    %c0_i32_2 = arith.constant 0 : i32
    return %c0_i32, %c0_i32_0, %c0_i32_1 : i32, i32, i32
  }
  func.func @transform_3(%arg0: i32, %arg1: i32) -> (i32, i32, i32) {
    %c0_i32 = arith.constant 0 : i32
    %c0_i32_0 = arith.constant 0 : i32
    %c0_i32_1 = arith.constant 0 : i32
    %c0_i32_2 = arith.constant 0 : i32
    return %c0_i32, %c0_i32_0, %c0_i32_1 : i32, i32, i32
  }
  func.func @transform_4(%arg0: i32, %arg1: i32) -> (i32, i32, i32) {
    %c0_i32 = arith.constant 0 : i32
    %c0_i32_0 = arith.constant 0 : i32
    %c0_i32_1 = arith.constant 0 : i32
    %c0_i32_2 = arith.constant 0 : i32
    return %c0_i32, %c0_i32_0, %c0_i32_1 : i32, i32, i32
  }
  func.func @transform_5(%arg0: i32, %arg1: i32) -> (i32, i32, i32) {
    %c0_i32 = arith.constant 0 : i32
    %c0_i32_0 = arith.constant 0 : i32
    %c0_i32_1 = arith.constant 0 : i32
    %c0_i32_2 = arith.constant 0 : i32
    return %c0_i32, %c0_i32_0, %c0_i32_1 : i32, i32, i32
  }
  func.func @transform_6(%arg0: i32, %arg1: i32) -> (i32, i32, i32) {
    %c0_i32 = arith.constant 0 : i32
    %c0_i32_0 = arith.constant 0 : i32
    %c0_i32_1 = arith.constant 0 : i32
    %c0_i32_2 = arith.constant 0 : i32
    return %c0_i32, %c0_i32_0, %c0_i32_1 : i32, i32, i32
  }
  func.func @transform_7(%arg0: i32, %arg1: i32) -> (i32, i32, i32) {
    %c0_i32 = arith.constant 0 : i32
    %c0_i32_0 = arith.constant 0 : i32
    %c0_i32_1 = arith.constant 0 : i32
    %c0_i32_2 = arith.constant 0 : i32
    return %c0_i32, %c0_i32_0, %c0_i32_1 : i32, i32, i32
  }
  func.func @transform_8(%arg0: i32, %arg1: i32) -> (i32, i32, i32) {
    %c0_i32 = arith.constant 0 : i32
    %c0_i32_0 = arith.constant 0 : i32
    %c0_i32_1 = arith.constant 0 : i32
    %c0_i32_2 = arith.constant 0 : i32
    return %c0_i32, %c0_i32_0, %c0_i32_1 : i32, i32, i32
  }
  func.func @transform_9(%arg0: i32, %arg1: i32) -> (i32, i32) {
    %c0_i32 = arith.constant 0 : i32
    %c0_i32_0 = arith.constant 0 : i32
    %c0_i32_1 = arith.constant 0 : i32
    return %c0_i32, %c0_i32_0 : i32, i32
  }
  func.func @transform_10(%arg0: i32, %arg1: i32) -> (i32, i32, i32) {
    %c0_i32 = arith.constant 0 : i32
    %c0_i32_0 = arith.constant 0 : i32
    return %arg0, %arg1, %c0_i32 : i32, i32, i32
  }
}

module attributes {stable_mosaic.version = 11 : i64} {
  func.func @_cross_attention_kernel(%arg0: i32, %arg1: i32, %arg2: memref<1x16x32xbf16, #tpu.memory_space<vmem>>, %arg3: memref<1x8x24xbf16, #tpu.memory_space<vmem>>, %arg4: memref<4x32x8xbf16, #tpu.memory_space<vmem>>, %arg5: memref<4x1x8xf32, #tpu.memory_space<vmem>>, %arg6: memref<4x24x8xbf16, #tpu.memory_space<vmem>>, %arg7: memref<4x1x8xf32, #tpu.memory_space<vmem>>, %arg8: memref<4x24x8xbf16, #tpu.memory_space<vmem>>, %arg9: memref<4x1x8xf32, #tpu.memory_space<vmem>>, %arg10: memref<4x8x32xbf16, #tpu.memory_space<vmem>>, %arg11: memref<1x32xf32, #tpu.memory_space<vmem>>, %arg12: memref<1x16x32xf32, #tpu.memory_space<vmem>>) attributes {dimension_semantics = [#tpu.dimension_semantics<parallel>, #tpu.dimension_semantics<parallel>], iteration_bounds = array<i64: 2, 1>, scalar_prefetch = 0 : i64, scratch_operands = 0 : i64, tpu.core_type = #tpu.core_type<tc>, window_params = [{transform_indices = @transform_0, window_bounds = array<i64: 1, 16, 32>}, {transform_indices = @transform_1, window_bounds = array<i64: 1, 8, 24>}, {pipeline_mode = #tpu.pipeline_mode<synchronous>, transform_indices = @transform_2, window_bounds = array<i64: 4, 32, 8>}, {pipeline_mode = #tpu.pipeline_mode<synchronous>, transform_indices = @transform_3, window_bounds = array<i64: 4, 1, 8>}, {pipeline_mode = #tpu.pipeline_mode<synchronous>, transform_indices = @transform_4, window_bounds = array<i64: 4, 24, 8>}, {pipeline_mode = #tpu.pipeline_mode<synchronous>, transform_indices = @transform_5, window_bounds = array<i64: 4, 1, 8>}, {pipeline_mode = #tpu.pipeline_mode<synchronous>, transform_indices = @transform_6, window_bounds = array<i64: 4, 24, 8>}, {pipeline_mode = #tpu.pipeline_mode<synchronous>, transform_indices = @transform_7, window_bounds = array<i64: 4, 1, 8>}, {pipeline_mode = #tpu.pipeline_mode<synchronous>, transform_indices = @transform_8, window_bounds = array<i64: 4, 8, 32>}, {pipeline_mode = #tpu.pipeline_mode<synchronous>, transform_indices = @transform_9, window_bounds = array<i64: 1, 32>}, {transform_indices = @transform_10, window_bounds = array<i64: 1, 16, 32>}]} {
    %c0 = arith.constant 0 : index
    %c0_0 = arith.constant 0 : index
    %c0_1 = arith.constant 0 : index
    %0 = vector.load %arg2[%c0, %c0_0, %c0_1] : memref<1x16x32xbf16, #tpu.memory_space<vmem>>, vector<1x16x32xbf16>
    %1 = vector.shape_cast %0 : vector<1x16x32xbf16> to vector<16x32xbf16>
    %c0_2 = arith.constant 0 : index
    %c0_3 = arith.constant 0 : index
    %c0_4 = arith.constant 0 : index
    %2 = vector.load %arg3[%c0_2, %c0_3, %c0_4] : memref<1x8x24xbf16, #tpu.memory_space<vmem>>, vector<1x8x24xbf16>
    %3 = vector.shape_cast %2 : vector<1x8x24xbf16> to vector<8x24xbf16>
    %cst = arith.constant 0.000000e+00 : f32
    %4 = vector.broadcast %cst : f32 to vector<16x32xf32>
    %c0_5 = arith.constant 0 : index
    %c0_6 = arith.constant 0 : index
    %c0_7 = arith.constant 0 : index
    %5 = vector.load %arg4[%c0_5, %c0_6, %c0_7] : memref<4x32x8xbf16, #tpu.memory_space<vmem>>, vector<1x32x8xbf16>
    %6 = vector.shape_cast %5 : vector<1x32x8xbf16> to vector<32x8xbf16>
    %cst_8 = arith.constant dense<0.000000e+00> : vector<16x8xf32>
    %7 = tpu.matmul %1, %6, %cst_8 {dimension_numbers = #tpu.dot_dimension_numbers<[1], [0], [0], [1], [0, 0, 1, 1], [], []>} : vector<16x32xbf16>, vector<32x8xbf16>, vector<16x8xf32> -> vector<16x8xf32>
    %c0_9 = arith.constant 0 : index
    %c0_10 = arith.constant 0 : index
    %c0_11 = arith.constant 0 : index
    %8 = vector.load %arg5[%c0_9, %c0_10, %c0_11] : memref<4x1x8xf32, #tpu.memory_space<vmem>>, vector<1x1x8xf32>
    %9 = vector.shape_cast %8 : vector<1x1x8xf32> to vector<1x8xf32>
    %10 = vector.broadcast %9 : vector<1x8xf32> to vector<16x8xf32>
    %11 = arith.addf %7, %10 : vector<16x8xf32>
    %c0_12 = arith.constant 0 : index
    %c0_13 = arith.constant 0 : index
    %c0_14 = arith.constant 0 : index
    %12 = vector.load %arg6[%c0_12, %c0_13, %c0_14] : memref<4x24x8xbf16, #tpu.memory_space<vmem>>, vector<1x24x8xbf16>
    %13 = vector.shape_cast %12 : vector<1x24x8xbf16> to vector<24x8xbf16>
    %cst_15 = arith.constant dense<0.000000e+00> : vector<8x8xf32>
    %14 = tpu.matmul %3, %13, %cst_15 {dimension_numbers = #tpu.dot_dimension_numbers<[1], [0], [0], [1], [0, 0, 1, 1], [], []>} : vector<8x24xbf16>, vector<24x8xbf16>, vector<8x8xf32> -> vector<8x8xf32>
    %c0_16 = arith.constant 0 : index
    %c0_17 = arith.constant 0 : index
    %c0_18 = arith.constant 0 : index
    %15 = vector.load %arg7[%c0_16, %c0_17, %c0_18] : memref<4x1x8xf32, #tpu.memory_space<vmem>>, vector<1x1x8xf32>
    %16 = vector.shape_cast %15 : vector<1x1x8xf32> to vector<1x8xf32>
    %17 = vector.broadcast %16 : vector<1x8xf32> to vector<8x8xf32>
    %18 = arith.addf %14, %17 : vector<8x8xf32>
    %c0_19 = arith.constant 0 : index
    %c0_20 = arith.constant 0 : index
    %c0_21 = arith.constant 0 : index
    %19 = vector.load %arg8[%c0_19, %c0_20, %c0_21] : memref<4x24x8xbf16, #tpu.memory_space<vmem>>, vector<1x24x8xbf16>
    %20 = vector.shape_cast %19 : vector<1x24x8xbf16> to vector<24x8xbf16>
    %cst_22 = arith.constant dense<0.000000e+00> : vector<8x8xf32>
    %21 = tpu.matmul %3, %20, %cst_22 {dimension_numbers = #tpu.dot_dimension_numbers<[1], [0], [0], [1], [0, 0, 1, 1], [], []>} : vector<8x24xbf16>, vector<24x8xbf16>, vector<8x8xf32> -> vector<8x8xf32>
    %c0_23 = arith.constant 0 : index
    %c0_24 = arith.constant 0 : index
    %c0_25 = arith.constant 0 : index
    %22 = vector.load %arg9[%c0_23, %c0_24, %c0_25] : memref<4x1x8xf32, #tpu.memory_space<vmem>>, vector<1x1x8xf32>
    %23 = vector.shape_cast %22 : vector<1x1x8xf32> to vector<1x8xf32>
    %24 = vector.broadcast %23 : vector<1x8xf32> to vector<8x8xf32>
    %25 = arith.addf %21, %24 : vector<8x8xf32>
    %26 = arith.truncf %11 : vector<16x8xf32> to vector<16x8xbf16>
    %27 = arith.truncf %18 : vector<8x8xf32> to vector<8x8xbf16>
    %cst_26 = arith.constant dense<0.000000e+00> : vector<16x8xf32>
    %28 = tpu.matmul %26, %27, %cst_26 {dimension_numbers = #tpu.dot_dimension_numbers<[1], [1], [0], [0], [0, 0, 1, 0], [], []>} : vector<16x8xbf16>, vector<8x8xbf16>, vector<16x8xf32> -> vector<16x8xf32>
    %cst_27 = arith.constant 0.353553385 : f32
    %29 = vector.broadcast %cst_27 : f32 to vector<16x8xf32>
    %30 = arith.mulf %28, %29 : vector<16x8xf32>
    %cst_28 = arith.constant dense<0xFF800000> : vector<16xf32>
    %31 = vector.multi_reduction <maximumf>, %30, %cst_28 [1] : vector<16x8xf32> to vector<16xf32>
    %32 = vector.shape_cast %31 : vector<16xf32> to vector<16x1xf32>
    %33 = vector.broadcast %32 : vector<16x1xf32> to vector<16x8xf32>
    %34 = arith.subf %30, %33 : vector<16x8xf32>
    %35 = math.exp %34 : vector<16x8xf32>
    %cst_29 = arith.constant dense<0.000000e+00> : vector<16xf32>
    %36 = vector.multi_reduction <add>, %35, %cst_29 [1] : vector<16x8xf32> to vector<16xf32>
    %37 = vector.shape_cast %36 : vector<16xf32> to vector<16x1xf32>
    %38 = tpu.reciprocal %37 {approx = true} : vector<16x1xf32> -> vector<16x1xf32>
    %39 = vector.broadcast %38 : vector<16x1xf32> to vector<16x8xf32>
    %40 = arith.mulf %35, %39 : vector<16x8xf32>
    %41 = arith.truncf %40 : vector<16x8xf32> to vector<16x8xbf16>
    %42 = arith.truncf %25 : vector<8x8xf32> to vector<8x8xbf16>
    %cst_30 = arith.constant dense<0.000000e+00> : vector<16x8xf32>
    %43 = tpu.matmul %41, %42, %cst_30 {dimension_numbers = #tpu.dot_dimension_numbers<[1], [0], [0], [1], [0, 0, 1, 1], [], []>} : vector<16x8xbf16>, vector<8x8xbf16>, vector<16x8xf32> -> vector<16x8xf32>
    %44 = arith.truncf %43 : vector<16x8xf32> to vector<16x8xbf16>
    %c0_31 = arith.constant 0 : index
    %c0_32 = arith.constant 0 : index
    %c0_33 = arith.constant 0 : index
    %45 = vector.load %arg10[%c0_31, %c0_32, %c0_33] : memref<4x8x32xbf16, #tpu.memory_space<vmem>>, vector<1x8x32xbf16>
    %46 = vector.shape_cast %45 : vector<1x8x32xbf16> to vector<8x32xbf16>
    %cst_34 = arith.constant dense<0.000000e+00> : vector<16x32xf32>
    %47 = tpu.matmul %44, %46, %cst_34 {dimension_numbers = #tpu.dot_dimension_numbers<[1], [0], [0], [1], [0, 0, 1, 1], [], []>} : vector<16x8xbf16>, vector<8x32xbf16>, vector<16x32xf32> -> vector<16x32xf32>
    %48 = arith.addf %4, %47 : vector<16x32xf32>
    %c1 = arith.constant 1 : index
    %c0_35 = arith.constant 0 : index
    %c0_36 = arith.constant 0 : index
    %49 = vector.load %arg4[%c1, %c0_35, %c0_36] : memref<4x32x8xbf16, #tpu.memory_space<vmem>>, vector<1x32x8xbf16>
    %50 = vector.shape_cast %49 : vector<1x32x8xbf16> to vector<32x8xbf16>
    %cst_37 = arith.constant dense<0.000000e+00> : vector<16x8xf32>
    %51 = tpu.matmul %1, %50, %cst_37 {dimension_numbers = #tpu.dot_dimension_numbers<[1], [0], [0], [1], [0, 0, 1, 1], [], []>} : vector<16x32xbf16>, vector<32x8xbf16>, vector<16x8xf32> -> vector<16x8xf32>
    %c1_38 = arith.constant 1 : index
    %c0_39 = arith.constant 0 : index
    %c0_40 = arith.constant 0 : index
    %52 = vector.load %arg5[%c1_38, %c0_39, %c0_40] : memref<4x1x8xf32, #tpu.memory_space<vmem>>, vector<1x1x8xf32>
    %53 = vector.shape_cast %52 : vector<1x1x8xf32> to vector<1x8xf32>
    %54 = vector.broadcast %53 : vector<1x8xf32> to vector<16x8xf32>
    %55 = arith.addf %51, %54 : vector<16x8xf32>
    %c1_41 = arith.constant 1 : index
    %c0_42 = arith.constant 0 : index
    %c0_43 = arith.constant 0 : index
    %56 = vector.load %arg6[%c1_41, %c0_42, %c0_43] : memref<4x24x8xbf16, #tpu.memory_space<vmem>>, vector<1x24x8xbf16>
    %57 = vector.shape_cast %56 : vector<1x24x8xbf16> to vector<24x8xbf16>
    %cst_44 = arith.constant dense<0.000000e+00> : vector<8x8xf32>
    %58 = tpu.matmul %3, %57, %cst_44 {dimension_numbers = #tpu.dot_dimension_numbers<[1], [0], [0], [1], [0, 0, 1, 1], [], []>} : vector<8x24xbf16>, vector<24x8xbf16>, vector<8x8xf32> -> vector<8x8xf32>
    %c1_45 = arith.constant 1 : index
    %c0_46 = arith.constant 0 : index
    %c0_47 = arith.constant 0 : index
    %59 = vector.load %arg7[%c1_45, %c0_46, %c0_47] : memref<4x1x8xf32, #tpu.memory_space<vmem>>, vector<1x1x8xf32>
    %60 = vector.shape_cast %59 : vector<1x1x8xf32> to vector<1x8xf32>
    %61 = vector.broadcast %60 : vector<1x8xf32> to vector<8x8xf32>
    %62 = arith.addf %58, %61 : vector<8x8xf32>
    %c1_48 = arith.constant 1 : index
    %c0_49 = arith.constant 0 : index
    %c0_50 = arith.constant 0 : index
    %63 = vector.load %arg8[%c1_48, %c0_49, %c0_50] : memref<4x24x8xbf16, #tpu.memory_space<vmem>>, vector<1x24x8xbf16>
    %64 = vector.shape_cast %63 : vector<1x24x8xbf16> to vector<24x8xbf16>
    %cst_51 = arith.constant dense<0.000000e+00> : vector<8x8xf32>
    %65 = tpu.matmul %3, %64, %cst_51 {dimension_numbers = #tpu.dot_dimension_numbers<[1], [0], [0], [1], [0, 0, 1, 1], [], []>} : vector<8x24xbf16>, vector<24x8xbf16>, vector<8x8xf32> -> vector<8x8xf32>
    %c1_52 = arith.constant 1 : index
    %c0_53 = arith.constant 0 : index
    %c0_54 = arith.constant 0 : index
    %66 = vector.load %arg9[%c1_52, %c0_53, %c0_54] : memref<4x1x8xf32, #tpu.memory_space<vmem>>, vector<1x1x8xf32>
    %67 = vector.shape_cast %66 : vector<1x1x8xf32> to vector<1x8xf32>
    %68 = vector.broadcast %67 : vector<1x8xf32> to vector<8x8xf32>
    %69 = arith.addf %65, %68 : vector<8x8xf32>
    %70 = arith.truncf %55 : vector<16x8xf32> to vector<16x8xbf16>
    %71 = arith.truncf %62 : vector<8x8xf32> to vector<8x8xbf16>
    %cst_55 = arith.constant dense<0.000000e+00> : vector<16x8xf32>
    %72 = tpu.matmul %70, %71, %cst_55 {dimension_numbers = #tpu.dot_dimension_numbers<[1], [1], [0], [0], [0, 0, 1, 0], [], []>} : vector<16x8xbf16>, vector<8x8xbf16>, vector<16x8xf32> -> vector<16x8xf32>
    %cst_56 = arith.constant 0.353553385 : f32
    %73 = vector.broadcast %cst_56 : f32 to vector<16x8xf32>
    %74 = arith.mulf %72, %73 : vector<16x8xf32>
    %cst_57 = arith.constant dense<0xFF800000> : vector<16xf32>
    %75 = vector.multi_reduction <maximumf>, %74, %cst_57 [1] : vector<16x8xf32> to vector<16xf32>
    %76 = vector.shape_cast %75 : vector<16xf32> to vector<16x1xf32>
    %77 = vector.broadcast %76 : vector<16x1xf32> to vector<16x8xf32>
    %78 = arith.subf %74, %77 : vector<16x8xf32>
    %79 = math.exp %78 : vector<16x8xf32>
    %cst_58 = arith.constant dense<0.000000e+00> : vector<16xf32>
    %80 = vector.multi_reduction <add>, %79, %cst_58 [1] : vector<16x8xf32> to vector<16xf32>
    %81 = vector.shape_cast %80 : vector<16xf32> to vector<16x1xf32>
    %82 = tpu.reciprocal %81 {approx = true} : vector<16x1xf32> -> vector<16x1xf32>
    %83 = vector.broadcast %82 : vector<16x1xf32> to vector<16x8xf32>
    %84 = arith.mulf %79, %83 : vector<16x8xf32>
    %85 = arith.truncf %84 : vector<16x8xf32> to vector<16x8xbf16>
    %86 = arith.truncf %69 : vector<8x8xf32> to vector<8x8xbf16>
    %cst_59 = arith.constant dense<0.000000e+00> : vector<16x8xf32>
    %87 = tpu.matmul %85, %86, %cst_59 {dimension_numbers = #tpu.dot_dimension_numbers<[1], [0], [0], [1], [0, 0, 1, 1], [], []>} : vector<16x8xbf16>, vector<8x8xbf16>, vector<16x8xf32> -> vector<16x8xf32>
    %88 = arith.truncf %87 : vector<16x8xf32> to vector<16x8xbf16>
    %c1_60 = arith.constant 1 : index
    %c0_61 = arith.constant 0 : index
    %c0_62 = arith.constant 0 : index
    %89 = vector.load %arg10[%c1_60, %c0_61, %c0_62] : memref<4x8x32xbf16, #tpu.memory_space<vmem>>, vector<1x8x32xbf16>
    %90 = vector.shape_cast %89 : vector<1x8x32xbf16> to vector<8x32xbf16>
    %cst_63 = arith.constant dense<0.000000e+00> : vector<16x32xf32>
    %91 = tpu.matmul %88, %90, %cst_63 {dimension_numbers = #tpu.dot_dimension_numbers<[1], [0], [0], [1], [0, 0, 1, 1], [], []>} : vector<16x8xbf16>, vector<8x32xbf16>, vector<16x32xf32> -> vector<16x32xf32>
    %92 = arith.addf %48, %91 : vector<16x32xf32>
    %c2 = arith.constant 2 : index
    %c0_64 = arith.constant 0 : index
    %c0_65 = arith.constant 0 : index
    %93 = vector.load %arg4[%c2, %c0_64, %c0_65] : memref<4x32x8xbf16, #tpu.memory_space<vmem>>, vector<1x32x8xbf16>
    %94 = vector.shape_cast %93 : vector<1x32x8xbf16> to vector<32x8xbf16>
    %cst_66 = arith.constant dense<0.000000e+00> : vector<16x8xf32>
    %95 = tpu.matmul %1, %94, %cst_66 {dimension_numbers = #tpu.dot_dimension_numbers<[1], [0], [0], [1], [0, 0, 1, 1], [], []>} : vector<16x32xbf16>, vector<32x8xbf16>, vector<16x8xf32> -> vector<16x8xf32>
    %c2_67 = arith.constant 2 : index
    %c0_68 = arith.constant 0 : index
    %c0_69 = arith.constant 0 : index
    %96 = vector.load %arg5[%c2_67, %c0_68, %c0_69] : memref<4x1x8xf32, #tpu.memory_space<vmem>>, vector<1x1x8xf32>
    %97 = vector.shape_cast %96 : vector<1x1x8xf32> to vector<1x8xf32>
    %98 = vector.broadcast %97 : vector<1x8xf32> to vector<16x8xf32>
    %99 = arith.addf %95, %98 : vector<16x8xf32>
    %c2_70 = arith.constant 2 : index
    %c0_71 = arith.constant 0 : index
    %c0_72 = arith.constant 0 : index
    %100 = vector.load %arg6[%c2_70, %c0_71, %c0_72] : memref<4x24x8xbf16, #tpu.memory_space<vmem>>, vector<1x24x8xbf16>
    %101 = vector.shape_cast %100 : vector<1x24x8xbf16> to vector<24x8xbf16>
    %cst_73 = arith.constant dense<0.000000e+00> : vector<8x8xf32>
    %102 = tpu.matmul %3, %101, %cst_73 {dimension_numbers = #tpu.dot_dimension_numbers<[1], [0], [0], [1], [0, 0, 1, 1], [], []>} : vector<8x24xbf16>, vector<24x8xbf16>, vector<8x8xf32> -> vector<8x8xf32>
    %c2_74 = arith.constant 2 : index
    %c0_75 = arith.constant 0 : index
    %c0_76 = arith.constant 0 : index
    %103 = vector.load %arg7[%c2_74, %c0_75, %c0_76] : memref<4x1x8xf32, #tpu.memory_space<vmem>>, vector<1x1x8xf32>
    %104 = vector.shape_cast %103 : vector<1x1x8xf32> to vector<1x8xf32>
    %105 = vector.broadcast %104 : vector<1x8xf32> to vector<8x8xf32>
    %106 = arith.addf %102, %105 : vector<8x8xf32>
    %c2_77 = arith.constant 2 : index
    %c0_78 = arith.constant 0 : index
    %c0_79 = arith.constant 0 : index
    %107 = vector.load %arg8[%c2_77, %c0_78, %c0_79] : memref<4x24x8xbf16, #tpu.memory_space<vmem>>, vector<1x24x8xbf16>
    %108 = vector.shape_cast %107 : vector<1x24x8xbf16> to vector<24x8xbf16>
    %cst_80 = arith.constant dense<0.000000e+00> : vector<8x8xf32>
    %109 = tpu.matmul %3, %108, %cst_80 {dimension_numbers = #tpu.dot_dimension_numbers<[1], [0], [0], [1], [0, 0, 1, 1], [], []>} : vector<8x24xbf16>, vector<24x8xbf16>, vector<8x8xf32> -> vector<8x8xf32>
    %c2_81 = arith.constant 2 : index
    %c0_82 = arith.constant 0 : index
    %c0_83 = arith.constant 0 : index
    %110 = vector.load %arg9[%c2_81, %c0_82, %c0_83] : memref<4x1x8xf32, #tpu.memory_space<vmem>>, vector<1x1x8xf32>
    %111 = vector.shape_cast %110 : vector<1x1x8xf32> to vector<1x8xf32>
    %112 = vector.broadcast %111 : vector<1x8xf32> to vector<8x8xf32>
    %113 = arith.addf %109, %112 : vector<8x8xf32>
    %114 = arith.truncf %99 : vector<16x8xf32> to vector<16x8xbf16>
    %115 = arith.truncf %106 : vector<8x8xf32> to vector<8x8xbf16>
    %cst_84 = arith.constant dense<0.000000e+00> : vector<16x8xf32>
    %116 = tpu.matmul %114, %115, %cst_84 {dimension_numbers = #tpu.dot_dimension_numbers<[1], [1], [0], [0], [0, 0, 1, 0], [], []>} : vector<16x8xbf16>, vector<8x8xbf16>, vector<16x8xf32> -> vector<16x8xf32>
    %cst_85 = arith.constant 0.353553385 : f32
    %117 = vector.broadcast %cst_85 : f32 to vector<16x8xf32>
    %118 = arith.mulf %116, %117 : vector<16x8xf32>
    %cst_86 = arith.constant dense<0xFF800000> : vector<16xf32>
    %119 = vector.multi_reduction <maximumf>, %118, %cst_86 [1] : vector<16x8xf32> to vector<16xf32>
    %120 = vector.shape_cast %119 : vector<16xf32> to vector<16x1xf32>
    %121 = vector.broadcast %120 : vector<16x1xf32> to vector<16x8xf32>
    %122 = arith.subf %118, %121 : vector<16x8xf32>
    %123 = math.exp %122 : vector<16x8xf32>
    %cst_87 = arith.constant dense<0.000000e+00> : vector<16xf32>
    %124 = vector.multi_reduction <add>, %123, %cst_87 [1] : vector<16x8xf32> to vector<16xf32>
    %125 = vector.shape_cast %124 : vector<16xf32> to vector<16x1xf32>
    %126 = tpu.reciprocal %125 {approx = true} : vector<16x1xf32> -> vector<16x1xf32>
    %127 = vector.broadcast %126 : vector<16x1xf32> to vector<16x8xf32>
    %128 = arith.mulf %123, %127 : vector<16x8xf32>
    %129 = arith.truncf %128 : vector<16x8xf32> to vector<16x8xbf16>
    %130 = arith.truncf %113 : vector<8x8xf32> to vector<8x8xbf16>
    %cst_88 = arith.constant dense<0.000000e+00> : vector<16x8xf32>
    %131 = tpu.matmul %129, %130, %cst_88 {dimension_numbers = #tpu.dot_dimension_numbers<[1], [0], [0], [1], [0, 0, 1, 1], [], []>} : vector<16x8xbf16>, vector<8x8xbf16>, vector<16x8xf32> -> vector<16x8xf32>
    %132 = arith.truncf %131 : vector<16x8xf32> to vector<16x8xbf16>
    %c2_89 = arith.constant 2 : index
    %c0_90 = arith.constant 0 : index
    %c0_91 = arith.constant 0 : index
    %133 = vector.load %arg10[%c2_89, %c0_90, %c0_91] : memref<4x8x32xbf16, #tpu.memory_space<vmem>>, vector<1x8x32xbf16>
    %134 = vector.shape_cast %133 : vector<1x8x32xbf16> to vector<8x32xbf16>
    %cst_92 = arith.constant dense<0.000000e+00> : vector<16x32xf32>
    %135 = tpu.matmul %132, %134, %cst_92 {dimension_numbers = #tpu.dot_dimension_numbers<[1], [0], [0], [1], [0, 0, 1, 1], [], []>} : vector<16x8xbf16>, vector<8x32xbf16>, vector<16x32xf32> -> vector<16x32xf32>
    %136 = arith.addf %92, %135 : vector<16x32xf32>
    %c3 = arith.constant 3 : index
    %c0_93 = arith.constant 0 : index
    %c0_94 = arith.constant 0 : index
    %137 = vector.load %arg4[%c3, %c0_93, %c0_94] : memref<4x32x8xbf16, #tpu.memory_space<vmem>>, vector<1x32x8xbf16>
    %138 = vector.shape_cast %137 : vector<1x32x8xbf16> to vector<32x8xbf16>
    %cst_95 = arith.constant dense<0.000000e+00> : vector<16x8xf32>
    %139 = tpu.matmul %1, %138, %cst_95 {dimension_numbers = #tpu.dot_dimension_numbers<[1], [0], [0], [1], [0, 0, 1, 1], [], []>} : vector<16x32xbf16>, vector<32x8xbf16>, vector<16x8xf32> -> vector<16x8xf32>
    %c3_96 = arith.constant 3 : index
    %c0_97 = arith.constant 0 : index
    %c0_98 = arith.constant 0 : index
    %140 = vector.load %arg5[%c3_96, %c0_97, %c0_98] : memref<4x1x8xf32, #tpu.memory_space<vmem>>, vector<1x1x8xf32>
    %141 = vector.shape_cast %140 : vector<1x1x8xf32> to vector<1x8xf32>
    %142 = vector.broadcast %141 : vector<1x8xf32> to vector<16x8xf32>
    %143 = arith.addf %139, %142 : vector<16x8xf32>
    %c3_99 = arith.constant 3 : index
    %c0_100 = arith.constant 0 : index
    %c0_101 = arith.constant 0 : index
    %144 = vector.load %arg6[%c3_99, %c0_100, %c0_101] : memref<4x24x8xbf16, #tpu.memory_space<vmem>>, vector<1x24x8xbf16>
    %145 = vector.shape_cast %144 : vector<1x24x8xbf16> to vector<24x8xbf16>
    %cst_102 = arith.constant dense<0.000000e+00> : vector<8x8xf32>
    %146 = tpu.matmul %3, %145, %cst_102 {dimension_numbers = #tpu.dot_dimension_numbers<[1], [0], [0], [1], [0, 0, 1, 1], [], []>} : vector<8x24xbf16>, vector<24x8xbf16>, vector<8x8xf32> -> vector<8x8xf32>
    %c3_103 = arith.constant 3 : index
    %c0_104 = arith.constant 0 : index
    %c0_105 = arith.constant 0 : index
    %147 = vector.load %arg7[%c3_103, %c0_104, %c0_105] : memref<4x1x8xf32, #tpu.memory_space<vmem>>, vector<1x1x8xf32>
    %148 = vector.shape_cast %147 : vector<1x1x8xf32> to vector<1x8xf32>
    %149 = vector.broadcast %148 : vector<1x8xf32> to vector<8x8xf32>
    %150 = arith.addf %146, %149 : vector<8x8xf32>
    %c3_106 = arith.constant 3 : index
    %c0_107 = arith.constant 0 : index
    %c0_108 = arith.constant 0 : index
    %151 = vector.load %arg8[%c3_106, %c0_107, %c0_108] : memref<4x24x8xbf16, #tpu.memory_space<vmem>>, vector<1x24x8xbf16>
    %152 = vector.shape_cast %151 : vector<1x24x8xbf16> to vector<24x8xbf16>
    %cst_109 = arith.constant dense<0.000000e+00> : vector<8x8xf32>
    %153 = tpu.matmul %3, %152, %cst_109 {dimension_numbers = #tpu.dot_dimension_numbers<[1], [0], [0], [1], [0, 0, 1, 1], [], []>} : vector<8x24xbf16>, vector<24x8xbf16>, vector<8x8xf32> -> vector<8x8xf32>
    %c3_110 = arith.constant 3 : index
    %c0_111 = arith.constant 0 : index
    %c0_112 = arith.constant 0 : index
    %154 = vector.load %arg9[%c3_110, %c0_111, %c0_112] : memref<4x1x8xf32, #tpu.memory_space<vmem>>, vector<1x1x8xf32>
    %155 = vector.shape_cast %154 : vector<1x1x8xf32> to vector<1x8xf32>
    %156 = vector.broadcast %155 : vector<1x8xf32> to vector<8x8xf32>
    %157 = arith.addf %153, %156 : vector<8x8xf32>
    %158 = arith.truncf %143 : vector<16x8xf32> to vector<16x8xbf16>
    %159 = arith.truncf %150 : vector<8x8xf32> to vector<8x8xbf16>
    %cst_113 = arith.constant dense<0.000000e+00> : vector<16x8xf32>
    %160 = tpu.matmul %158, %159, %cst_113 {dimension_numbers = #tpu.dot_dimension_numbers<[1], [1], [0], [0], [0, 0, 1, 0], [], []>} : vector<16x8xbf16>, vector<8x8xbf16>, vector<16x8xf32> -> vector<16x8xf32>
    %cst_114 = arith.constant 0.353553385 : f32
    %161 = vector.broadcast %cst_114 : f32 to vector<16x8xf32>
    %162 = arith.mulf %160, %161 : vector<16x8xf32>
    %cst_115 = arith.constant dense<0xFF800000> : vector<16xf32>
    %163 = vector.multi_reduction <maximumf>, %162, %cst_115 [1] : vector<16x8xf32> to vector<16xf32>
    %164 = vector.shape_cast %163 : vector<16xf32> to vector<16x1xf32>
    %165 = vector.broadcast %164 : vector<16x1xf32> to vector<16x8xf32>
    %166 = arith.subf %162, %165 : vector<16x8xf32>
    %167 = math.exp %166 : vector<16x8xf32>
    %cst_116 = arith.constant dense<0.000000e+00> : vector<16xf32>
    %168 = vector.multi_reduction <add>, %167, %cst_116 [1] : vector<16x8xf32> to vector<16xf32>
    %169 = vector.shape_cast %168 : vector<16xf32> to vector<16x1xf32>
    %170 = tpu.reciprocal %169 {approx = true} : vector<16x1xf32> -> vector<16x1xf32>
    %171 = vector.broadcast %170 : vector<16x1xf32> to vector<16x8xf32>
    %172 = arith.mulf %167, %171 : vector<16x8xf32>
    %173 = arith.truncf %172 : vector<16x8xf32> to vector<16x8xbf16>
    %174 = arith.truncf %157 : vector<8x8xf32> to vector<8x8xbf16>
    %cst_117 = arith.constant dense<0.000000e+00> : vector<16x8xf32>
    %175 = tpu.matmul %173, %174, %cst_117 {dimension_numbers = #tpu.dot_dimension_numbers<[1], [0], [0], [1], [0, 0, 1, 1], [], []>} : vector<16x8xbf16>, vector<8x8xbf16>, vector<16x8xf32> -> vector<16x8xf32>
    %176 = arith.truncf %175 : vector<16x8xf32> to vector<16x8xbf16>
    %c3_118 = arith.constant 3 : index
    %c0_119 = arith.constant 0 : index
    %c0_120 = arith.constant 0 : index
    %177 = vector.load %arg10[%c3_118, %c0_119, %c0_120] : memref<4x8x32xbf16, #tpu.memory_space<vmem>>, vector<1x8x32xbf16>
    %178 = vector.shape_cast %177 : vector<1x8x32xbf16> to vector<8x32xbf16>
    %cst_121 = arith.constant dense<0.000000e+00> : vector<16x32xf32>
    %179 = tpu.matmul %176, %178, %cst_121 {dimension_numbers = #tpu.dot_dimension_numbers<[1], [0], [0], [1], [0, 0, 1, 1], [], []>} : vector<16x8xbf16>, vector<8x32xbf16>, vector<16x32xf32> -> vector<16x32xf32>
    %180 = arith.addf %136, %179 : vector<16x32xf32>
    %c0_122 = arith.constant 0 : index
    %c0_123 = arith.constant 0 : index
    %181 = vector.load %arg11[%c0_122, %c0_123] : memref<1x32xf32, #tpu.memory_space<vmem>>, vector<1x32xf32>
    %182 = vector.broadcast %181 : vector<1x32xf32> to vector<16x32xf32>
    %183 = arith.addf %180, %182 : vector<16x32xf32>
    %c0_124 = arith.constant 0 : index
    %c0_125 = arith.constant 0 : index
    %c0_126 = arith.constant 0 : index
    %184 = vector.load %arg12[%c0_124, %c0_125, %c0_126] : memref<1x16x32xf32, #tpu.memory_space<vmem>>, vector<1x16x32xf32>
    %185 = vector.shape_cast %184 : vector<1x16x32xf32> to vector<16x32xf32>
    %186 = vector.shape_cast %183 : vector<16x32xf32> to vector<1x16x32xf32>
    tpu.vector_store %arg12[%c0_124, %c0_125, %c0_126], %186 {strides = array<i32>} : memref<1x16x32xf32, #tpu.memory_space<vmem>>, vector<1x16x32xf32>,
    return
  }
  func.func @transform_0(%arg0: i32, %arg1: i32) -> (i32, i32, i32) {
    %c0_i32 = arith.constant 0 : i32
    %c0_i32_0 = arith.constant 0 : i32
    return %arg0, %arg1, %c0_i32 : i32, i32, i32
  }
  func.func @transform_1(%arg0: i32, %arg1: i32) -> (i32, i32, i32) {
    %c0_i32 = arith.constant 0 : i32
    %c0_i32_0 = arith.constant 0 : i32
    %c0_i32_1 = arith.constant 0 : i32
    return %arg0, %c0_i32, %c0_i32_0 : i32, i32, i32
  }
  func.func @transform_2(%arg0: i32, %arg1: i32) -> (i32, i32, i32) {
    %c0_i32 = arith.constant 0 : i32
    %c0_i32_0 = arith.constant 0 : i32
    %c0_i32_1 = arith.constant 0 : i32
    %c0_i32_2 = arith.constant 0 : i32
    return %c0_i32, %c0_i32_0, %c0_i32_1 : i32, i32, i32
  }
  func.func @transform_3(%arg0: i32, %arg1: i32) -> (i32, i32, i32) {
    %c0_i32 = arith.constant 0 : i32
    %c0_i32_0 = arith.constant 0 : i32
    %c0_i32_1 = arith.constant 0 : i32
    %c0_i32_2 = arith.constant 0 : i32
    return %c0_i32, %c0_i32_0, %c0_i32_1 : i32, i32, i32
  }
  func.func @transform_4(%arg0: i32, %arg1: i32) -> (i32, i32, i32) {
    %c0_i32 = arith.constant 0 : i32
    %c0_i32_0 = arith.constant 0 : i32
    %c0_i32_1 = arith.constant 0 : i32
    %c0_i32_2 = arith.constant 0 : i32
    return %c0_i32, %c0_i32_0, %c0_i32_1 : i32, i32, i32
  }
  func.func @transform_5(%arg0: i32, %arg1: i32) -> (i32, i32, i32) {
    %c0_i32 = arith.constant 0 : i32
    %c0_i32_0 = arith.constant 0 : i32
    %c0_i32_1 = arith.constant 0 : i32
    %c0_i32_2 = arith.constant 0 : i32
    return %c0_i32, %c0_i32_0, %c0_i32_1 : i32, i32, i32
  }
  func.func @transform_6(%arg0: i32, %arg1: i32) -> (i32, i32, i32) {
    %c0_i32 = arith.constant 0 : i32
    %c0_i32_0 = arith.constant 0 : i32
    %c0_i32_1 = arith.constant 0 : i32
    %c0_i32_2 = arith.constant 0 : i32
    return %c0_i32, %c0_i32_0, %c0_i32_1 : i32, i32, i32
  }
  func.func @transform_7(%arg0: i32, %arg1: i32) -> (i32, i32, i32) {
    %c0_i32 = arith.constant 0 : i32
    %c0_i32_0 = arith.constant 0 : i32
    %c0_i32_1 = arith.constant 0 : i32
    %c0_i32_2 = arith.constant 0 : i32
    return %c0_i32, %c0_i32_0, %c0_i32_1 : i32, i32, i32
  }
  func.func @transform_8(%arg0: i32, %arg1: i32) -> (i32, i32, i32) {
    %c0_i32 = arith.constant 0 : i32
    %c0_i32_0 = arith.constant 0 : i32
    %c0_i32_1 = arith.constant 0 : i32
    %c0_i32_2 = arith.constant 0 : i32
    return %c0_i32, %c0_i32_0, %c0_i32_1 : i32, i32, i32
  }
  func.func @transform_9(%arg0: i32, %arg1: i32) -> (i32, i32) {
    %c0_i32 = arith.constant 0 : i32
    %c0_i32_0 = arith.constant 0 : i32
    %c0_i32_1 = arith.constant 0 : i32
    return %c0_i32, %c0_i32_0 : i32, i32
  }
  func.func @transform_10(%arg0: i32, %arg1: i32) -> (i32, i32, i32) {
    %c0_i32 = arith.constant 0 : i32
    %c0_i32_0 = arith.constant 0 : i32
    return %arg0, %arg1, %c0_i32 : i32, i32, i32
  }
}

</mosaic_0001>

<bundles_post_ra>
// kernel: tpu_custom_call.1
= control target key start
LH: loop header
LB: loop body
LE: loop exit
PB: predicated region body
PF: predicated region fallthrough
CT: control target
= control target key end

     0   :  { %15 = vsyncpa [#allocation3], 0  ;;  %s3032_s0 = inlined_call_operand.vmem [shape: bf16[2,16,32], index: 0, kind: input, shape index: {}]   ;;  %s3033_s1 = inlined_call_operand.vmem [shape: bf16[2,8,24], index: 1, kind: input, shape index: {}]   ;;  %s3034_s2 = inlined_call_operand.vmem [shape: bf16[4,32,8], index: 2, kind: input, shape index: {}]   ;;  %s3035_s3 = inlined_call_operand.vmem [shape: f32[4,1,8], index: 3, kind: input, shape index: {}]   ;;  %s3036_s4 = inlined_call_operand.vmem [shape: bf16[4,24,8], index: 4, kind: input, shape index: {}]   ;;  %s3037_s5 = inlined_call_operand.vmem [shape: f32[4,1,8], index: 5, kind: input, shape index: {}]   ;;  %s3038_s6 = inlined_call_operand.vmem [shape: bf16[4,24,8], index: 6, kind: input, shape index: {}]   ;;  %s3039_s7 = inlined_call_operand.vmem [shape: f32[4,1,8], index: 7, kind: input, shape index: {}]   ;;  %s3040_s8 = inlined_call_operand.vmem [shape: bf16[4,8,32], index: 8, kind: input, shape index: {}]   ;;  %s3041_s9 = inlined_call_operand.vmem [shape: f32[1,32], index: 9, kind: input, shape index: {}]   ;;  %s3042_s10 = inlined_call_operand.hbm [shape: f32[2,16,32], index: 10, kind: output, shape index: {}]  }
   0x1   :  { %17 = vsyncpa [#allocation3 + $0x1], 0  ;;  %s2608_s13 = smov 0   ;;  %s2610_s14 = smov 0  }
   0x2   :  { %s2612_s15 = smov 0   ;;  %s2614_s16 = smov 0  }
   0x3   :  { %s2616_s17 = smov 0   ;;  %s2618_s18 = smov 0  }
   0x4 LB: > { %s2004_s19 = sadd.s32 4294967295, %s2546_s18   ;;  %s2005_s20 = sadd.s32 4294967294, %s2546_s18   ;;  %s2546_s18 = sphi %s2618_s18, %s23_s18   ;;  %s2542_s17 = sphi %s2616_s17, %s3049_s17   ;;  %s2538_s16 = sphi %s2614_s16, %s3048_s16   ;;  %s2534_s15 = sphi %s2612_s15, %s3047_s15   ;;  %s2530_s14 = sphi %s2610_s14, %s3046_s14   ;;  %s2526_s13 = sphi %s2608_s13, %s3045_s13  }
   0x5   : > { %s35_s21 = sadd.s32 1, %s2542_s17  ;;  %s266_s22 = sadd.s32 1, %s2534_s15 }
   0x6   : > { %p37_p0 = scmp.ge.s32.totalorder %s35_s21, 2  ;;  %p276_p1 = scmp.ne.s32.totalorder %s2534_s15, %s2530_s14 }
   0x7   : > { %p277_p2 = scmp.eq.s32.totalorder %s2004_s19, 1  ;;  %p282_p3 = scmp.ne.s32.totalorder %s2530_s14, %s2526_s13 }
   0x8   : > { %s3051_s21 = smov (%p37_p0, %s35_s21), 0  ;;  %p283_p5 = scmp.eq.s32.totalorder %s2005_s20, 1 }
   0x9   : > { %p2648_p4 = por %p277_p2, %p276_p1  ;;  %s261_s24 = ssub.s32 %s2542_s17, %s3051_s21 }
   0xa   : > { %p2008_p6 = scmp.ge.s32.totalorder %s2546_s18, 1  ;;  %p264_p7 = scmp.eq.s32.totalorder %s261_s24, 0 }
   0xb   : > { %p2655_p8 = por %p283_p5, %p282_p3  ;;  %p345_p9 = scmp.lt.s32.totalorder %s2546_s18, 3 }
   0xc   : > { %s2661_s26 = scalar_select %p264_p7, %s2534_s15, %s266_s22  }
   0xd   : > { %p346_p10 = pnand %p2008_p6, %p345_p9 }
   0xe   : > { %v2411_v0 = vld [vmem:[%s3036_s4] sm:$0xff] (!%p346_p10)   ;;  %v2548_v1 = vmov (!%p346_p10), 0.0   ;;  %vm506_vm0 = vcmask (!%p346_p10), 1043456   ;;  %v2413_v3 = vld [vmem:[%s3036_s4 + $0x8] ss:$0 sps:$4 sm:$0xff] (!%p346_p10)   ;;  %p392_p11 = scmp.lt.s32.totalorder (!%p346_p10), %s2538_s16, 1 }
   0xf   : > { %349 = sbr.rel (%p346_p10) target bundleno = 3952 (0xf70), region = 60  ;;  %2192 = vmatprep.subr.bf16.mxu1 (!%p346_p10), %v2548_v1  ;;  %2184 = vmatprep.subr.bf16.mxu0 (!%p346_p10), %v2548_v1  ;;  %v2412_v2 = vld [vmem:[%s3034_s2] sm:$0xff] (!%p346_p10)   ;;  %v2414_v4 = vld [vmem:[%s3034_s2 + $0x8] sm:$0xff] (!%p346_p10)   ;;  %v508_v5 = vsel (!%p346_p10), %vm506_vm0, %v2413_v3, 0  ;;  %vm2549_vm1 = vmmov (!%p346_p10), 0   ;;  %vm502_vm2 = vcmask (!%p346_p10), 195584  }
  0x10   : > { %2193 = vmatpush3.bf16.msra.mxu1 (!%p346_p10), %v2411_v0  ;;  %2185 = vmatpush3.bf16.msra.mxu0 (!%p346_p10), %v2412_v2  ;;  %vm438_vm3 = vcmask (!%p346_p10), 261120   ;;  %v2018_v8 = vld [vmem:[%s3037_s5] ss:$0 sm:$0xff] (!%p346_p10)  ;;  %vm614_vm4 = vcmask (!%p346_p10), 64512   ;;  %v2417_v25 = vld [vmem:[%s3038_s6 + $0x8] ss:$0 sps:$4 sm:$0xff] (!%p346_p10)  }
  0x11   : > { %2194 = vmatprep.subr.bf16.mxu1 (!%p346_p10), %v2548_v1  ;;  %2186 = vmatprep.subr.bf16.mxu0 (!%p346_p10), %v2548_v1  ;;  %v2013_v10 = vld [vmem:[%s3035_s3] ss:$0 sm:$0xff] (!%p346_p10)  ;;  %v570_v26 = vsel (!%p346_p10), %vm506_vm0, %v2417_v25, 0  ;;  %v2419_v53 = vld [vmem:[%s3034_s2 + $0x10] sm:$0xff] (!%p346_p10)   ;;  %v2421_v54 = vld [vmem:[%s3034_s2 + $0x18] sm:$0xff] (!%p346_p10)   ;;  %s2123_s12 = sshll.u32 (!%p346_p10), %s2538_s16, 8 }
  0x12   : > { %2196 = vmatprep.mubr.msk.bf16.mxu1 (!%p346_p10), %vm2549_vm1, %v2548_v1  ;;  %2188 = vmatprep.mubr.msk.bf16.mxu0 (!%p346_p10), %vm2549_vm1, %v2548_v1  ;;  %v2416_v24 = vld [vmem:[%s3038_s6] sm:$0xff] (!%p346_p10)   ;;  %v2418_v61 = vld [vmem:[%s3036_s4 + $0xc] sm:$0xff] (!%p346_p10)   ;;  %v2420_v63 = vld [vmem:[%s3036_s4 + $0x14] ss:$0 sps:$4 sm:$0xff] (!%p346_p10)   ;;  %s2550_s28 = smov (!%p346_p10), [#allocation2]  }
  0x13   : > { %v2022_v48 = vld [vmem:[%s3039_s7] ss:$0 sm:$0xff] (!%p346_p10)  ;;  %v825_v0 = vsel (!%p346_p10), %vm506_vm0, %v2420_v63, 0  ;;  %v2422_v25 = vld [vmem:[%s3038_s6 + $0xc] sm:$0xff] (!%p346_p10)   ;;  %s2472_s29 = sshll.u32 (!%p346_p10), %s2550_s28, 4  ;;  %s2473_s29 = int_to_ptr.vmem [resolvable:$false] %s2472_s29 }
  0x14   : > { %2195 = vmatpush3.bf16.msra.mxu1 (!%p346_p10), %v508_v5  ;;  %2187 = vmatpush3.bf16.msra.mxu0 (!%p346_p10), %v2414_v4  ;;  %v2033_v4 = vld [vmem:[%s3035_s3 + $0x1] ss:$0 sm:$0xff] (!%p346_p10) }
  0x15   : > { %2208 = vmatprep.subr.bf16.mxu1 (!%p346_p10), %v2548_v1  ;;  %2200 = vmatprep.subr.bf16.mxu0 (!%p346_p10), %v2548_v1 }
  0x16   : > { %s393_s22 = scalar_select %p392_p11, %s2538_s16, 1 }
  0x18   : > { %s2012_s24 = sshll.u32 %s393_s22, 2  ;;  %s2122_s27 = sshll.u32 %s393_s22, 3 }
  0x19   : > { %s404_s30 = scalar_lea.vmem %s3033_s1, %s2012_s24  ;;  %s399_s19 = scalar_lea.vmem %s3032_s0, %s2122_s27 }
  0x1a   : > { %v2694_v6 = vld [vmem:[%s404_s30] sm:$0xf]  ;;  %s388_s24 = sand.u32 1, %s2530_s14   ;;  %s2980_s22 = scalar_lea.hbm %s3042_s10, %s2123_s12 }
  0x1b   : > { %2197 = vmatmul.mubr.msk.bf16.vlgmr.msra.gmra.mrb[0].mxu1 %vm502_vm2, %v2694_v6  ;;  %v2698_v7 = vld [vmem:[%s399_s19] sm:$0xff]   ;;  %s2009_s27 = sshll.u32 %s388_s24, 4  ;;  %s2986_s16 = scalar_lea.sflag [#allocation3], %s388_s24 }
  0x1c   : > { %2210 = vmatprep.mubr.msk.bf16.mxu1 %vm2549_vm1, %v2548_v1  ;;  %2189 = vmatmul.mubr.msk.bf16.vlgmr.msra.gmra.mrb[0].mxu0 %vm438_vm3, %v2698_v7  ;;  %s390_s30 = scalar_lea.vmem [#allocation2], %s2009_s27  ;;  %s2474_s12 = scalar_lea.vmem %s2473_s29, 512 }
  0x1d   : > { %2204 = vmatprep.mubr.msk.bf16.mxu0 %vm2549_vm1, %v2548_v1  ;;  %2201 = vmatpush3.bf16.msra.mxu0 %v2416_v24  ;;  %s1913_s11 = sshll.u32 %s390_s30, 4  ;;  %s2982_s11 = int_to_ptr.vmem [resolvable:$true] %s1913_s11 }
  0x1e   : > { %2202 = vmatprep.subr.bf16.mxu0 %v2548_v1  ;;  %s2468_s27 = scalar_lea.vmem %s2982_s11, 256  ;;  %p2475_p1 = scmp.lt.s32.totalorder %s2982_s11, %s2473_s29 }
  0x1f   : > { %p2469_p12 = scmp.ne.s32.totalorder %s2982_s11, %s2468_s27  ;;  %p2476_p2 = scmp.lt.s32.totalorder %s2474_s12, %s2468_s27 }
  0x21   : > { %2203 = vmatpush3.bf16.msra.mxu0 %v570_v26  ;;  %v2423_v26 = vld [vmem:[%s3038_s6 + $0x14] ss:$0 sps:$4 sm:$0xff]   ;;  %p2470_p13 = pnand %p2469_p12, %p2648_p4  ;;  %p2477_p3 = por %p2476_p2, %p2475_p1 }
  0x22   : > { %2214 = vmatprep.subr.bf16.mxu0 %v2548_v1 }
  0x23   : > { %p2471_p0 = pneg %p2470_p13 }
  0x24   : > { %2205 = vmatmul.mubr.msk.bf16.vlgmr.msra.gmra.mrb[4].mxu0 %vm502_vm2, %v2694_v6 }
  0x25   : > { %2216 = vmatprep.mubr.msk.bf16.mxu0 %vm2549_vm1, %v2548_v1  ;;  %p2478_p5 = pnand %p2477_p3, %p2471_p0 }
  0xee   : > { %v544_v9 = vpop.f32.mrb[0].mxu1 }
  0xef   : > { %v545_v11 = vadd.f32 %v2018_v8, %v544_v9  ;;  %v2198_v12 = vpop.f32.mrb[1].mxu1  ;;  %v476_v14 = vpop.f32.mrb[0].mxu0 }
  0xf0   : > { %v547_v13 = vpop.f32.mrb[2].mxu1  ;;  %v477_v16 = vadd.f32 %v2013_v10, %v476_v14  ;;  %v2190_v18 = vpop.f32.mrb[1].mxu0 }
  0xf1   : > { %v613_v15 = vpack.c.bf16 %v545_v11, %v545_v11  ;;  %v2199_v17 = vpop.f32.mrb[3].mxu1  ;;  %v479_v19 = vpop.f32.mrb[2].mxu0 }
  0xf2   : > { %v480_v21 = vadd.f32 %v2013_v10, %v479_v19  ;;  %v2191_v22 = vpop.f32.mrb[3].mxu0  ;;  %v2041_v17 = vld [vmem:[%s3037_s5 + $0x1] ss:$0 sm:$0xff] }
  0xf3   : > { %v619_v20 = vsel %vm614_vm4, %v613_v15, 0 }
  0xf4   : > { %2209 = vmatpush3.bf16.xpose.msra.mxu1 %v619_v20  ;;  %v612_v23 = vpack.c.bf16 %v480_v21, %v477_v16 }
  0xf5   : > { %2220 = vmatprep.subr.bf16.mxu1 %v2548_v1 }
  0xf7   : > { %v606_v45 = vpop.f32.mrb[4].mxu0 }
  0xf8   : > { %v2206_v46 = vpop.f32.mrb[5].mxu0  ;;  %v607_v50 = vadd.f32 %v2022_v48, %v606_v45 }
  0xf9   : > { %v609_v47 = vpop.f32.mrb[6].mxu0 }
  0xfa   : > { %v2207_v49 = vpop.f32.mrb[7].mxu0  ;;  %v687_v51 = vpack.c.bf16 %v607_v50, %v607_v50 }
  0xfb   : > { %2211 = vmatmul.mubr.msk.bf16.vlgmr.msra.gmra.mrb[4].mxu1 %vm614_vm4, %v612_v23  ;;  %v2049_v49 = vld [vmem:[%s3039_s7 + $0x1] ss:$0 sm:$0xff] }
  0xfc   : > { %2224 = vmatprep.mubr.msk.bf16.mxu1 %vm2549_vm1, %v2548_v1  ;;  %v692_v52 = vsel %vm506_vm0, %v687_v51, 0  ;;  %2221 = vmatpush3.bf16.msra.mxu1 %v2419_v53 }
  0xfd   : > { %2215 = vmatpush3.bf16.msra.mxu0 %v692_v52  ;;  %2222 = vmatprep.subr.bf16.mxu1 %v2548_v1 }
  0xfe   : > { %2228 = vmatprep.subr.bf16.mxu0 %v2548_v1 }
 0x100   : > { %2223 = vmatpush3.bf16.msra.mxu1 %v2421_v54  ;;  %v2055_v54 = vld [vmem:[%s3040_s8 + $0x4] sm:$0xf] }
 0x101   : > { %2236 = vmatprep.subr.bf16.mxu1 %v2548_v1 }
 0x103   : > { %2225 = vmatmul.mubr.msk.bf16.vlgmr.msra.gmra.mrb[8].mxu1 %vm438_vm3, %v2698_v7 }
 0x104   : > { %2240 = vmatprep.mubr.msk.bf16.mxu1 %vm2549_vm1, %v2548_v1  ;;  %2237 = vmatpush3.bf16.msra.mxu1 %v2422_v25 }
 0x105   : > { %2238 = vmatprep.subr.bf16.mxu1 %v2548_v1 }
 0x1ce   : > { %v655_v27 = vpop.f32.mrb[4].mxu1 }
 0x1cf   : > { %v662_v28 = vmul.f32 0.35355338, %v655_v27  ;;  %v2212_v29 = vpop.f32.mrb[5].mxu1  ;;  %v889_v27 = vsel %vm506_vm0, %v2423_v26, 0 }
 0x1d0   : > { %v658_v30 = vpop.f32.mrb[6].mxu1  ;;  %2239 = vmatpush3.bf16.msra.mxu1 %v889_v27 }
 0x1d1   : > { %v663_v31 = vmul.f32 0.35355338, %v658_v30  ;;  %v2213_v32 = vpop.f32.mrb[7].mxu1  ;;  %v664_v33 = vsel %vm614_vm4, %v662_v28, -inf  ;;  %2250 = vmatprep.subr.bf16.mxu1 %v2548_v1 }
 0x1d2   : > { %665 = vmax.xlane.f32.xlu0 %v664_v33 }
 0x1d3   : > { %v667_v34 = vsel %vm614_vm4, %v663_v31, -inf  ;;  %2241 = vmatmul.mubr.msk.bf16.vlgmr.msra.gmra.mrb[12].mxu1 %vm502_vm2, %v2694_v6 }
 0x1d4   : > { %2252 = vmatprep.mubr.msk.bf16.mxu1 %vm2549_vm1, %v2548_v1 }
 0x1d6   : > { %668 = vmax.xlane.f32.xlu0 %v667_v34  ;;  %v796_v2 = vpop.f32.mrb[8].mxu1 }
 0x1d7   : > { %v2226_v3 = vpop.f32.mrb[9].mxu1  ;;  %v797_v8 = vadd.f32 %v2033_v4, %v796_v2  ;;  %v2424_v2 = vld [vmem:[%s3036_s4 + $0x18] sm:$0xff]  }
 0x1d8   : > { %v799_v5 = vpop.f32.mrb[10].mxu1  ;;  %v2425_v3 = vld [vmem:[%s3036_s4 + $0x20] ss:$0 sps:$4 sm:$0xff]  }
 0x1d9   : > { %v800_v9 = vadd.f32 %v2033_v4, %v799_v5  ;;  %v2227_v10 = vpop.f32.mrb[11].mxu1  ;;  %v1238_v4 = vsel %vm506_vm0, %v2425_v3, 0 }
 0x1da   : > { %v2426_v10 = vld [vmem:[%s3034_s2 + $0x20] sm:$0xff]  }
 0x1db   : > { %v931_v11 = vpack.c.bf16 %v800_v9, %v797_v8 }
 0x25f   : > { %v666_v35 = vpop.xlane.xlu0 %665 }
 0x260   : > { %v670_v36 = vsub.f32 %v662_v28, %v666_v35 }
 0x262   : > { %v672_v37 = vmul.f32 1.442695, %v670_v36 }
 0x263   : > { %v669_v38 = vpop.xlane.xlu0 %668 }
 0x264   : > { %2436 = vpow2.f32 %v672_v37  ;;  %v671_v39 = vsub.f32 %v663_v31, %v669_v38 }
 0x266   : > { %v674_v40 = vmul.f32 1.442695, %v671_v39 }
 0x268   : > { %2438 = vpow2.f32 %v674_v40 }
 0x26e   : > { %v2437_v41 = vpop.eup %2436 }
 0x26f   : > { %v676_v42 = vsel %vm614_vm4, %v2437_v41, 0.0 }
 0x270   : > { %677 = vadd.xlane.f32.xlu1 %v676_v42 }
 0x272   : > { %v2439_v43 = vpop.eup %2438 }
 0x273   : > { %v679_v44 = vsel %vm614_vm4, %v2439_v43, 0.0 }
 0x274   : > { %680 = vadd.xlane.f32.xlu1 %v679_v44 }
 0x2a6   : > { %v925_v46 = vpop.f32.mrb[12].mxu1 }
 0x2a7   : > { %v2242_v47 = vpop.f32.mrb[13].mxu1  ;;  %v926_v51 = vadd.f32 %v2049_v49, %v925_v46 }
 0x2a8   : > { %v928_v48 = vpop.f32.mrb[14].mxu1 }
 0x2a9   : > { %v2243_v50 = vpop.f32.mrb[15].mxu1  ;;  %v1005_v52 = vpack.c.bf16 %v926_v51, %v926_v51 }
 0x2ab   : > { %v1010_v53 = vsel %vm506_vm0, %v1005_v52, 0 }
 0x2ac   : > { %2251 = vmatpush3.bf16.msra.mxu1 %v1010_v53 }
 0x2ad   : > { %2262 = vmatprep.subr.bf16.mxu1 %v2548_v1 }
 0x2fd   : > { %v678_v55 = vpop.xlane.xlu1 %677 }
 0x2fe   : > { %2440 = vrcp.f32 %v678_v55  ;;  %v1060_v55 = vsel %vm506_vm0, %v2055_v54, 0 }
 0x301   : > { %v681_v56 = vpop.xlane.xlu1 %680 }
 0x302   : > { %2442 = vrcp.f32 %v681_v56 }
 0x308   : > { %v2441_v57 = vpop.eup %2440 }
 0x309   : > { %v684_v59 = vmul.f32 %v2441_v57, %v2437_v41 }
 0x30c   : > { %v2443_v58 = vpop.eup %2442 }
 0x30d   : > { %v685_v60 = vmul.f32 %v2443_v58, %v2439_v43 }
 0x30f   : > { %v686_v62 = vpack.c.bf16 %v685_v60, %v684_v59  ;;  %v736_v60 = vld [vmem:[%s3040_s8] sm:$0xf] }
 0x311   : > { %2217 = vmatmul.mubr.msk.bf16.vlgmr.msra.gmra.mrb[8].mxu0 %vm614_vm4, %v686_v62 }
 0x312   : > { %2229 = vmatpush3.bf16.msra.mxu0 %v2418_v61  ;;  %2232 = vmatprep.mubr.msk.bf16.mxu0 %vm2549_vm1, %v2548_v1 }
 0x313   : > { %2230 = vmatprep.subr.bf16.mxu0 %v2548_v1 }
 0x316   : > { %2231 = vmatpush3.bf16.msra.mxu0 %v825_v0  ;;  %v1107_v0 = vsel %vm506_vm0, %v736_v60, 0 }
 0x317   : > { %2244 = vmatprep.subr.bf16.mxu0 %v2548_v1 }
 0x319   : > { %2233 = vmatmul.mubr.msk.bf16.vlgmr.msra.gmra.mrb[12].mxu0 %vm502_vm2, %v2694_v6 }
 0x31a   : > { %2246 = vmatprep.mubr.msk.bf16.mxu0 %vm2549_vm1, %v2548_v1 }
 0x3e4   : > { %v2770_v12 = vpop.f32.mrb[8].mxu0 }
 0x3e5   : > { %v2218_v13 = vpop.f32.mrb[9].mxu0 }
 0x3e6   : > { %v2772_v14 = vpop.f32.mrb[10].mxu0  ;;  %v2427_v13 = vld [vmem:[%s3034_s2 + $0x28] sm:$0xff]  }
 0x3e7   : > { %v735_v15 = vpack.c.bf16 %v2772_v14, %v2770_v12  ;;  %v2219_v16 = vpop.f32.mrb[11].mxu0 }
 0x3ec   : > { %v861_v18 = vpop.f32.mrb[12].mxu0 }
 0x3ed   : > { %v862_v19 = vadd.f32 %v2041_v17, %v861_v18  ;;  %v2234_v20 = vpop.f32.mrb[13].mxu0  ;;  %v2071_v18 = vld [vmem:[%s3037_s5 + $0x2] ss:$0 sm:$0xff] }
 0x3ee   : > { %v864_v21 = vpop.f32.mrb[14].mxu0 }
 0x3ef   : > { %v932_v22 = vpack.c.bf16 %v862_v19, %v862_v19  ;;  %v2235_v23 = vpop.f32.mrb[15].mxu0 }
 0x3f1   : > { %v937_v24 = vsel %vm614_vm4, %v932_v22, 0 }
 0x3f2   : > { %2245 = vmatpush3.bf16.xpose.msra.mxu0 %v937_v24 }
 0x3f3   : > { %2256 = vmatprep.subr.bf16.mxu0 %v2548_v1 }
 0x3f9   : > { %2247 = vmatmul.mubr.msk.bf16.vlgmr.msra.gmra.mrb[16].mxu0 %vm614_vm4, %v931_v11 }
 0x3fa   : > { %2258 = vmatprep.mubr.msk.bf16.mxu0 %vm2549_vm1, %v2548_v1  ;;  %2257 = vmatpush3.bf16.msra.mxu0 %v1060_v55 }
 0x3fb   : > { %2268 = vmatprep.subr.bf16.mxu0 %v2548_v1 }
 0x4cc   : > { %v973_v28 = vpop.f32.mrb[16].mxu0 }
 0x4cd   : > { %v980_v29 = vmul.f32 0.35355338, %v973_v28  ;;  %v2248_v30 = vpop.f32.mrb[17].mxu0 }
 0x4ce   : > { %v976_v31 = vpop.f32.mrb[18].mxu0 }
 0x4cf   : > { %v981_v32 = vmul.f32 0.35355338, %v976_v31  ;;  %v2249_v33 = vpop.f32.mrb[19].mxu0  ;;  %v982_v34 = vsel %vm614_vm4, %v980_v29, -inf }
 0x4d0   : > { %983 = vmax.xlane.f32.xlu0 %v982_v34 }
 0x4d1   : > { %v985_v35 = vsel %vm614_vm4, %v981_v32, -inf }
 0x4d2   : > { %986 = vmax.xlane.f32.xlu1 %v985_v35 }
 0x55d   : > { %v984_v36 = vpop.xlane.xlu0 %983 }
 0x55e   : > { %v988_v37 = vsub.f32 %v980_v29, %v984_v36 }
 0x55f   : > { %v987_v38 = vpop.xlane.xlu1 %986 }
 0x560   : > { %v990_v39 = vmul.f32 1.442695, %v988_v37  ;;  %v989_v40 = vsub.f32 %v981_v32, %v987_v38  ;;  %v2063_v32 = vld [vmem:[%s3035_s3 + $0x2] ss:$0 sm:$0xff] }
 0x562   : > { %2444 = vpow2.f32 %v990_v39  ;;  %v992_v41 = vmul.f32 1.442695, %v989_v40  ;;  %v2428_v40 = vld [vmem:[%s3038_s6 + $0x18] sm:$0xff]  }
 0x564   : > { %2446 = vpow2.f32 %v992_v41  ;;  %v2429_v41 = vld [vmem:[%s3038_s6 + $0x20] ss:$0 sps:$4 sm:$0xff]  }
 0x56c   : > { %v2445_v42 = vpop.eup %2444 }
 0x56d   : > { %v994_v43 = vsel %vm614_vm4, %v2445_v42, 0.0 }
 0x56e   : > { %v2447_v44 = vpop.eup %2446  ;;  %995 = vadd.xlane.f32.xlu0 %v994_v43 }
 0x56f   : > { %v997_v45 = vsel %vm614_vm4, %v2447_v44, 0.0 }
 0x570   : > { %998 = vadd.xlane.f32.xlu1 %v997_v45 }
 0x5fb   : > { %v996_v56 = vpop.xlane.xlu0 %995 }
 0x5fc   : > { %2448 = vrcp.f32 %v996_v56 }
 0x5fd   : > { %v999_v57 = vpop.xlane.xlu1 %998 }
 0x5fe   : > { %2450 = vrcp.f32 %v999_v57 }
 0x606   : > { %v2449_v58 = vpop.eup %2448 }
 0x607   : > { %v1002_v61 = vmul.f32 %v2449_v58, %v2445_v42  ;;  %v1302_v42 = vsel %vm506_vm0, %v2429_v41, 0 }
 0x608   : > { %v2451_v59 = vpop.eup %2450 }
 0x609   : > { %v1003_v62 = vmul.f32 %v2451_v59, %v2447_v44 }
 0x60b   : > { %v1004_v63 = vpack.c.bf16 %v1003_v62, %v1002_v61 }
 0x60d   : > { %2253 = vmatmul.mubr.msk.bf16.vlgmr.msra.gmra.mrb[16].mxu1 %vm614_vm4, %v1004_v63 }
 0x60e   : > { %2263 = vmatpush3.bf16.msra.mxu1 %v1107_v0  ;;  %2264 = vmatprep.mubr.msk.bf16.mxu1 %vm2549_vm1, %v2548_v1  ;;  %v2079_v0 = vld [vmem:[%s3039_s7 + $0x2] ss:$0 sm:$0xff] }
 0x60f   : > { %2276 = vmatprep.subr.bf16.mxu1 %v2548_v1 }
 0x615   : > { %2265 = vmatmul.mubr.msk.bf16.vlgmr.msra.gmra.mrb[20].mxu1 %vm614_vm4, %v735_v15 }
 0x616   : > { %2277 = vmatpush3.bf16.msra.mxu1 %v2424_v2  ;;  %2280 = vmatprep.mubr.msk.bf16.mxu1 %vm2549_vm1, %v2548_v1 }
 0x617   : > { %2278 = vmatprep.subr.bf16.mxu1 %v2548_v1 }
 0x61a   : > { %2279 = vmatpush3.bf16.msra.mxu1 %v1238_v4 }
 0x61b   : > { %2292 = vmatprep.subr.bf16.mxu1 %v2548_v1 }
 0x61d   : > { %2281 = vmatmul.mubr.msk.bf16.vlgmr.msra.gmra.mrb[24].mxu1 %vm502_vm2, %v2694_v6 }
 0x61e   : > { %2294 = vmatprep.mubr.msk.bf16.mxu1 %vm2549_vm1, %v2548_v1 }
 0x6e0   : > { %v1046_v5 = vpop.f32.mrb[16].mxu1 }
 0x6e1   : > { %v2254_v8 = vpop.f32.mrb[17].mxu1 }
 0x6e2   : > { %v1049_v9 = vpop.f32.mrb[18].mxu1  ;;  %v2085_v8 = vld [vmem:[%s3040_s8 + $0x8] sm:$0xf] }
 0x6e3   : > { %v1053_v11 = vpack.c.bf16 %v1049_v9, %v1046_v5  ;;  %v2255_v12 = vpop.f32.mrb[19].mxu1  ;;  %v1473_v9 = vsel %vm506_vm0, %v2085_v8, 0 }
 0x6e5   : > { %2259 = vmatmul.mubr.msk.bf16.vlgmr.msra.gmra.mrb[20].mxu0 %vm614_vm4, %v1053_v11 }
 0x6e6   : > { %2269 = vmatpush3.bf16.msra.mxu0 %v2426_v10  ;;  %2272 = vmatprep.mubr.msk.bf16.mxu0 %vm2549_vm1, %v2548_v1 }
 0x6e7   : > { %2270 = vmatprep.subr.bf16.mxu0 %v2548_v1 }
 0x6e8   : > { %v1143_v14 = vpop.f32.mrb[20].mxu1 }
 0x6e9   : > { %v2266_v15 = vpop.f32.mrb[21].mxu1 }
 0x6ea   : > { %v1146_v16 = vpop.f32.mrb[22].mxu1  ;;  %2271 = vmatpush3.bf16.msra.mxu0 %v2427_v13 }
 0x6eb   : > { %v2267_v17 = vpop.f32.mrb[23].mxu1  ;;  %2284 = vmatprep.subr.bf16.mxu0 %v2548_v1 }
 0x6ec   : > { %v2431_v17 = vld [vmem:[%s3034_s2 + $0x30] sm:$0xff]  }
 0x6ed   : > { %2273 = vmatmul.mubr.msk.bf16.vlgmr.msra.gmra.mrb[24].mxu0 %vm438_vm3, %v2698_v7 }
 0x6ee   : > { %2288 = vmatprep.mubr.msk.bf16.mxu0 %vm2549_vm1, %v2548_v1  ;;  %2285 = vmatpush3.bf16.msra.mxu0 %v2428_v40 }
 0x6ef   : > { %2286 = vmatprep.subr.bf16.mxu0 %v2548_v1 }
 0x6f0   : > { %v1274_v19 = vpop.f32.mrb[24].mxu1 }
 0x6f1   : > { %v1275_v20 = vadd.f32 %v2071_v18, %v1274_v19  ;;  %v2282_v21 = vpop.f32.mrb[25].mxu1  ;;  %v2433_v18 = vld [vmem:[%s3034_s2 + $0x38] sm:$0xff]  }
 0x6f2   : > { %v1277_v22 = vpop.f32.mrb[26].mxu1  ;;  %2287 = vmatpush3.bf16.msra.mxu0 %v1302_v42  ;;  %v2100_v42 = vld [vmem:[%s3037_s5 + $0x3] ss:$0 sm:$0xff] }
 0x6f3   : > { %v1345_v23 = vpack.c.bf16 %v1275_v20, %v1275_v20  ;;  %v2283_v24 = vpop.f32.mrb[27].mxu1  ;;  %2298 = vmatprep.subr.bf16.mxu0 %v2548_v1  ;;  %v2430_v22 = vld [vmem:[%s3036_s4 + $0x24] sm:$0xff]  }
 0x6f5   : > { %v1350_v25 = vsel %vm614_vm4, %v1345_v23, 0  ;;  %2289 = vmatmul.mubr.msk.bf16.vlgmr.msra.gmra.mrb[28].mxu0 %vm502_vm2, %v2694_v6 }
 0x6f6   : > { %2293 = vmatpush3.bf16.xpose.msra.mxu1 %v1350_v25  ;;  %2300 = vmatprep.mubr.msk.bf16.mxu0 %vm2549_vm1, %v2548_v1  ;;  %v2432_v25 = vld [vmem:[%s3036_s4 + $0x2c] ss:$0 sps:$4 sm:$0xff]  }
 0x6f7   : > { %2304 = vmatprep.subr.bf16.mxu1 %v2548_v1 }
 0x7b8   : > { %v1096_v26 = vpop.f32.mrb[20].mxu0 }
 0x7b9   : > { %v2858_v27 = vadd.f32 %v1143_v14, %v1096_v26  ;;  %v2260_v28 = vpop.f32.mrb[21].mxu0 }
 0x7ba   : > { %v1099_v29 = vpop.f32.mrb[22].mxu0 }
 0x7bb   : > { %v2860_v30 = vadd.f32 %v1146_v16, %v1099_v29  ;;  %v2261_v31 = vpop.f32.mrb[23].mxu0  ;;  %v2092_v29 = vld [vmem:[%s3035_s3 + $0x3] ss:$0 sm:$0xff] }
 0x7c0   : > { %v1209_v33 = vpop.f32.mrb[24].mxu0 }
 0x7c1   : > { %v2274_v34 = vpop.f32.mrb[25].mxu0  ;;  %v1210_v36 = vadd.f32 %v2063_v32, %v1209_v33 }
 0x7c2   : > { %v1212_v35 = vpop.f32.mrb[26].mxu0 }
 0x7c3   : > { %v1213_v37 = vadd.f32 %v2063_v32, %v1212_v35  ;;  %v2275_v38 = vpop.f32.mrb[27].mxu0 }
 0x7c5   : > { %v1344_v39 = vpack.c.bf16 %v1213_v37, %v1210_v36 }
 0x7c7   : > { %2295 = vmatmul.mubr.msk.bf16.vlgmr.msra.gmra.mrb[28].mxu1 %vm614_vm4, %v1344_v39 }
 0x7c8   : > { %2306 = vmatprep.mubr.msk.bf16.mxu1 %vm2549_vm1, %v2548_v1  ;;  %v1338_v61 = vpop.f32.mrb[28].mxu0  ;;  %2305 = vmatpush3.bf16.msra.mxu1 %v1473_v9  ;;  %v2108_v9 = vld [vmem:[%s3039_s7 + $0x3] ss:$0 sm:$0xff] }
 0x7c9   : > { %v2290_v62 = vpop.f32.mrb[29].mxu0  ;;  %v1339_v3 = vadd.f32 %v2079_v0, %v1338_v61  ;;  %2318 = vmatprep.subr.bf16.mxu1 %v2548_v1 }
 0x7ca   : > { %v1341_v63 = vpop.f32.mrb[30].mxu0 }
 0x7cb   : > { %v2291_v2 = vpop.f32.mrb[31].mxu0  ;;  %v1418_v4 = vpack.c.bf16 %v1339_v3, %v1339_v3 }
 0x7cd   : > { %v1423_v5 = vsel %vm506_vm0, %v1418_v4, 0 }
 0x7ce   : > { %2299 = vmatpush3.bf16.msra.mxu0 %v1423_v5 }
 0x7cf   : > { %2310 = vmatprep.subr.bf16.mxu0 %v2548_v1 }
 0x89a   : > { %v1386_v43 = vpop.f32.mrb[28].mxu1 }
 0x89b   : > { %v1393_v44 = vmul.f32 0.35355338, %v1386_v43  ;;  %v2296_v45 = vpop.f32.mrb[29].mxu1 }
 0x89c   : > { %v1389_v46 = vpop.f32.mrb[30].mxu1 }
 0x89d   : > { %v1394_v47 = vmul.f32 0.35355338, %v1389_v46  ;;  %v2297_v48 = vpop.f32.mrb[31].mxu1  ;;  %v1395_v49 = vsel %vm614_vm4, %v1393_v44, -inf }
 0x89e   : > { %1396 = vmax.xlane.f32.xlu0 %v1395_v49 }
 0x89f   : > { %v1398_v50 = vsel %vm614_vm4, %v1394_v47, -inf }
 0x8a0   : > { %1399 = vmax.xlane.f32.xlu1 %v1398_v50 }
 0x92b   : > { %v1397_v51 = vpop.xlane.xlu0 %1396 }
 0x92c   : > { %v1401_v52 = vsub.f32 %v1393_v44, %v1397_v51 }
 0x92d   : > { %v1400_v53 = vpop.xlane.xlu1 %1399 }
 0x92e   : > { %v1403_v54 = vmul.f32 1.442695, %v1401_v52  ;;  %v1402_v55 = vsub.f32 %v1394_v47, %v1400_v53 }
 0x930   : > { %2452 = vpow2.f32 %v1403_v54  ;;  %v1405_v56 = vmul.f32 1.442695, %v1402_v55 }
 0x932   : > { %2454 = vpow2.f32 %v1405_v56 }
 0x93a   : > { %v2453_v57 = vpop.eup %2452 }
 0x93b   : > { %v1407_v58 = vsel %vm614_vm4, %v2453_v57, 0.0 }
 0x93c   : > { %v2455_v59 = vpop.eup %2454  ;;  %1408 = vadd.xlane.f32.xlu0 %v1407_v58 }
 0x93d   : > { %v1410_v60 = vsel %vm614_vm4, %v2455_v59, 0.0 }
 0x93e   : > { %1411 = vadd.xlane.f32.xlu1 %v1410_v60 }
 0x9c9   : > { %v1409_v10 = vpop.xlane.xlu0 %1408 }
 0x9ca   : > { %2456 = vrcp.f32 %v1409_v10 }
 0x9cb   : > { %v1412_v11 = vpop.xlane.xlu1 %1411 }
 0x9cc   : > { %2458 = vrcp.f32 %v1412_v11 }
 0x9d4   : > { %v2457_v12 = vpop.eup %2456 }
 0x9d5   : > { %v1415_v14 = vmul.f32 %v2457_v12, %v2453_v57 }
 0x9d6   : > { %v2459_v13 = vpop.eup %2458 }
 0x9d7   : > { %v1416_v15 = vmul.f32 %v2459_v13, %v2455_v59 }
 0x9d9   : > { %v1417_v16 = vpack.c.bf16 %v1416_v15, %v1415_v14  ;;  %v2114_v14 = vld [vmem:[%s3040_s8 + $0xc] sm:$0xf] }
 0x9da   : > { %v1841_v15 = vsel %vm506_vm0, %v2114_v14, 0 }
 0x9db   : > { %2301 = vmatmul.mubr.msk.bf16.vlgmr.msra.gmra.mrb[32].mxu0 %vm614_vm4, %v1417_v16 }
 0x9dc   : > { %2314 = vmatprep.mubr.msk.bf16.mxu0 %vm2549_vm1, %v2548_v1  ;;  %2311 = vmatpush3.bf16.msra.mxu0 %v2431_v17 }
 0x9dd   : > { %2312 = vmatprep.subr.bf16.mxu0 %v2548_v1 }
 0x9e0   : > { %2313 = vmatpush3.bf16.msra.mxu0 %v2433_v18 }
 0x9e1   : > { %2326 = vmatprep.subr.bf16.mxu0 %v2548_v1 }
 0x9e3   : > { %2315 = vmatmul.mubr.msk.bf16.vlgmr.msra.gmra.mrb[36].mxu0 %vm438_vm3, %v2698_v7  ;;  %v1606_v7 = vsel %vm506_vm0, %v2432_v25, 0 }
 0x9e4   : > { %2330 = vmatprep.mubr.msk.bf16.mxu0 %vm2549_vm1, %v2548_v1 }
 0xaae   : > { %v1459_v19 = vpop.f32.mrb[32].mxu0 }
 0xaaf   : > { %v2302_v20 = vpop.f32.mrb[33].mxu0 }
 0xab0   : > { %v1462_v21 = vpop.f32.mrb[34].mxu0 }
 0xab1   : > { %v1466_v23 = vpack.c.bf16 %v1462_v21, %v1459_v19  ;;  %v2303_v24 = vpop.f32.mrb[35].mxu0 }
 0xab3   : > { %2307 = vmatmul.mubr.msk.bf16.vlgmr.msra.gmra.mrb[32].mxu1 %vm614_vm4, %v1466_v23 }
 0xab4   : > { %2319 = vmatpush3.bf16.msra.mxu1 %v2430_v22  ;;  %2322 = vmatprep.mubr.msk.bf16.mxu1 %vm2549_vm1, %v2548_v1 }
 0xab5   : > { %2320 = vmatprep.subr.bf16.mxu1 %v2548_v1 }
 0xab6   : > { %v1577_v26 = vpop.f32.mrb[36].mxu0 }
 0xab7   : > { %v2316_v28 = vpop.f32.mrb[37].mxu0  ;;  %v1578_v32 = vadd.f32 %v2092_v29, %v1577_v26 }
 0xab8   : > { %2321 = vmatpush3.bf16.msra.mxu1 %v1606_v7  ;;  %v1580_v31 = vpop.f32.mrb[38].mxu0 }
 0xab9   : > { %2334 = vmatprep.subr.bf16.mxu1 %v2548_v1  ;;  %v1581_v33 = vadd.f32 %v2092_v29, %v1580_v31  ;;  %v2317_v34 = vpop.f32.mrb[39].mxu0  ;;  %v2116_v29 = vld [vmem:[%s3041_s9] ss:$0 sm:$0xff] }
 0xabb   : > { %2323 = vmatmul.mubr.msk.bf16.vlgmr.msra.gmra.mrb[36].mxu1 %vm502_vm2, %v2694_v6  ;;  %v1712_v35 = vpack.c.bf16 %v1581_v33, %v1578_v32 }
 0xabc   : > { %2336 = vmatprep.mubr.msk.bf16.mxu1 %vm2549_vm1, %v2548_v1 }
 0xb86   : > { %v1509_v36 = vpop.f32.mrb[32].mxu1 }
 0xb87   : > { %v2930_v37 = vadd.f32 %v1509_v36, %v2858_v27  ;;  %v2308_v38 = vpop.f32.mrb[33].mxu1  ;;  %v2434_v27 = vld [vmem:[%s3038_s6 + $0x24] sm:$0xff]  }
 0xb88   : > { %v1512_v39 = vpop.f32.mrb[34].mxu1  ;;  %2327 = vmatpush3.bf16.msra.mxu0 %v2434_v27 }
 0xb89   : > { %v2933_v40 = vadd.f32 %v1512_v39, %v2860_v30  ;;  %v2309_v41 = vpop.f32.mrb[35].mxu1  ;;  %v2435_v30 = vld [vmem:[%s3038_s6 + $0x2c] ss:$0 sps:$4 sm:$0xff]   ;;  %2328 = vmatprep.subr.bf16.mxu0 %v2548_v1 }
 0xb8a   : > { %v1670_v50 = vsel %vm506_vm0, %v2435_v30, 0 }
 0xb8c   : > { %2329 = vmatpush3.bf16.msra.mxu0 %v1670_v50 }
 0xb8d   : > { %2340 = vmatprep.subr.bf16.mxu0 %v2548_v1 }
 0xb8e   : > { %v1642_v43 = vpop.f32.mrb[36].mxu1 }
 0xb8f   : > { %v1643_v44 = vadd.f32 %v2100_v42, %v1642_v43  ;;  %v2324_v45 = vpop.f32.mrb[37].mxu1  ;;  %2331 = vmatmul.mubr.msk.bf16.vlgmr.msra.gmra.mrb[40].mxu0 %vm502_vm2, %v2694_v6 }
 0xb90   : > { %v1645_v46 = vpop.f32.mrb[38].mxu1  ;;  %2342 = vmatprep.mubr.msk.bf16.mxu0 %vm2549_vm1, %v2548_v1 }
 0xb91   : > { %v1713_v47 = vpack.c.bf16 %v1643_v44, %v1643_v44  ;;  %v2325_v48 = vpop.f32.mrb[39].mxu1 }
 0xb93   : > { %v1718_v49 = vsel %vm614_vm4, %v1713_v47, 0 }
 0xb94   : > { %2335 = vmatpush3.bf16.xpose.msra.mxu1 %v1718_v49 }
 0xb95   : > { %2346 = vmatprep.subr.bf16.mxu1 %v2548_v1 }
 0xb9b   : > { %2337 = vmatmul.mubr.msk.bf16.vlgmr.msra.gmra.mrb[40].mxu1 %vm614_vm4, %v1712_v35 }
 0xb9c   : > { %2348 = vmatprep.mubr.msk.bf16.mxu1 %vm2549_vm1, %v2548_v1  ;;  %2347 = vmatpush3.bf16.msra.mxu1 %v1841_v15 }
 0xc62   : > { %v1706_v4 = vpop.f32.mrb[40].mxu0 }
 0xc63   : > { %v2332_v5 = vpop.f32.mrb[41].mxu0  ;;  %v1707_v11 = vadd.f32 %v2108_v9, %v1706_v4 }
 0xc64   : > { %v1709_v8 = vpop.f32.mrb[42].mxu0 }
 0xc65   : > { %v2333_v10 = vpop.f32.mrb[43].mxu0  ;;  %v1786_v12 = vpack.c.bf16 %v1707_v11, %v1707_v11 }
 0xc67   : > { %v1791_v13 = vsel %vm506_vm0, %v1786_v12, 0 }
 0xc68   : > { %2341 = vmatpush3.bf16.msra.mxu0 %v1791_v13 }
 0xc6e   : > { %v1754_v51 = vpop.f32.mrb[40].mxu1 }
 0xc6f   : > { %v1761_v52 = vmul.f32 0.35355338, %v1754_v51  ;;  %v2338_v53 = vpop.f32.mrb[41].mxu1 }
 0xc70   : > { %v1757_v54 = vpop.f32.mrb[42].mxu1 }
 0xc71   : > { %v1762_v55 = vmul.f32 0.35355338, %v1757_v54  ;;  %v2339_v56 = vpop.f32.mrb[43].mxu1  ;;  %v1763_v57 = vsel %vm614_vm4, %v1761_v52, -inf }
 0xc72   : > { %1764 = vmax.xlane.f32.xlu0 %v1763_v57 }
 0xc73   : > { %v1766_v58 = vsel %vm614_vm4, %v1762_v55, -inf }
 0xc74   : > { %1767 = vmax.xlane.f32.xlu1 %v1766_v58 }
 0xcff   : > { %v1765_v59 = vpop.xlane.xlu0 %1764 }
 0xd00   : > { %v1769_v60 = vsub.f32 %v1761_v52, %v1765_v59 }
 0xd01   : > { %v1768_v61 = vpop.xlane.xlu1 %1767 }
 0xd02   : > { %v1771_v62 = vmul.f32 1.442695, %v1769_v60  ;;  %v1770_v6 = vsub.f32 %v1762_v55, %v1768_v61 }
 0xd04   : > { %2460 = vpow2.f32 %v1771_v62  ;;  %v1773_v63 = vmul.f32 1.442695, %v1770_v6 }
 0xd06   : > { %2462 = vpow2.f32 %v1773_v63 }
 0xd0e   : > { %v2461_v1 = vpop.eup %2460 }
 0xd0f   : > { %v1775_v0 = vsel %vm614_vm4, %v2461_v1, 0.0 }
 0xd10   : > { %v2463_v2 = vpop.eup %2462  ;;  %1776 = vadd.xlane.f32.xlu0 %v1775_v0 }
 0xd11   : > { %v1778_v3 = vsel %vm614_vm4, %v2463_v2, 0.0 }
 0xd12   : > { %1779 = vadd.xlane.f32.xlu1 %v1778_v3 }
 0xd9d   : > { %v1777_v16 = vpop.xlane.xlu0 %1776 }
 0xd9e   : > { %2464 = vrcp.f32 %v1777_v16 }
 0xd9f   : > { %v1780_v17 = vpop.xlane.xlu1 %1779 }
 0xda0   : > { %2466 = vrcp.f32 %v1780_v17 }
 0xda8   : > { %v2465_v18 = vpop.eup %2464 }
 0xda9   : > { %v1783_v20 = vmul.f32 %v2465_v18, %v2461_v1 }
 0xdaa   : > { %v2467_v19 = vpop.eup %2466 }
 0xdab   : > { %v1784_v21 = vmul.f32 %v2467_v19, %v2463_v2 }
 0xdad   : > { %v1785_v22 = vpack.c.bf16 %v1784_v21, %v1783_v20 }
 0xdaf   : > { %2343 = vmatmul.mubr.msk.bf16.vlgmr.msra.gmra.mrb[44].mxu0 %vm614_vm4, %v1785_v22 }
 0xe82   : > { %v1827_v23 = vpop.f32.mrb[44].mxu0 }
 0xe83   : > { %v2344_v24 = vpop.f32.mrb[45].mxu0 }
 0xe84   : > { %v1830_v25 = vpop.f32.mrb[46].mxu0 }
 0xe85   : > { %v1834_v7 = vpack.c.bf16 %v1830_v25, %v1827_v23  ;;  %v2345_v26 = vpop.f32.mrb[47].mxu0 }
 0xe87   : > { %2349 = vmatmul.mubr.msk.bf16.vlgmr.msra.gmra.mrb[44].mxu1 %vm614_vm4, %v1834_v7 }
 0xf5a   : > { %v1877_v28 = vpop.f32.mrb[44].mxu1 }
 0xf5b   : > { %v1884_v31 = vadd.f32 %v1877_v28, %v2930_v37  ;;  %v2350_v32 = vpop.f32.mrb[45].mxu1 }
 0xf5c   : > { %v1880_v33 = vpop.f32.mrb[46].mxu1 }
 0xf5d   : > { %v1893_v34 = vadd.f32 %v2116_v29, %v1884_v31  ;;  %v1885_v35 = vadd.f32 %v1880_v33, %v2933_v40  ;;  %v2351_v36 = vpop.f32.mrb[47].mxu1 }
 0xf5f   : > { %1895 = vst.msk [vmem:[%s390_s30] sm:$0xff] %vm438_vm3, %v1893_v34  ;;  %v1894_v37 = vadd.f32 %v2116_v29, %v1885_v35 }
 0xf61   : > { %1896 = vst.msk [vmem:[%s390_s30 + $0x8] sm:$0xff] %vm438_vm3, %v1894_v37 }
 0xf62   : > { %2481 = shalt.err (!%p2478_p5)
}
 0xf63   : > { %s2482_s24 = scalar_lea.hbm %s2980_s22, 256  ;;  %s2486_s20 = scalar_lea.hbm %s3042_s10, 512 }
 0xf64   : > { %p2483_p6 = scmp.ne.s32.totalorder %s2980_s22, %s2482_s24  ;;  %p2487_p10 = scmp.lt.u32.totalorder %s2980_s22, %s3042_s10 }
 0xf65   : > { %p2488_p11 = scmp.lt.u32.totalorder %s2486_s20, %s2482_s24  ;;  %p2490_p13 = scmp.lt.u32.totalorder %s2482_s24, %s2980_s22 }
 0xf66   : > { %p2484_p7 = pnand %p2483_p6, %p2648_p4 }
 0xf67   : > { %p2489_p12 = por %p2488_p11, %p2487_p10 }
 0xf68   : > { %p2485_p9 = pneg %p2484_p7 }
 0xf69   : > { %p2491_p0 = por %p2490_p13, %p2489_p12 }
 0xf6b   : > { %p2492_p1 = pnand %p2491_p0, %p2485_p9 }
 0xf6d   : > { %2495 = shalt.err (!%p2492_p1)
}
 0xf6e   : > { %s2551_s27 = smov 128   ;;  %s2552_s12 = smov 8  }
 0xf6f   : > { %2352 = dma.vmem_to_hbm [thread:$0]  (%p2648_p4), %s2982_s11, 256, %s2980_s22, %s2986_s16, %s2551_s27, %s2551_s27, %s2552_s12  }
 0xf70 PF: > { %p2358_p2 = scmp.ge.s32.totalorder %s2546_s18, 2  ;;  %s1928_s30 = sand.u32 1, %s2526_s13  }
 0xf71   : > { %s1929_s24 = scalar_lea.sflag [#allocation3], %s1928_s30 }
 0xf72   : > { %p2355_p3 = pnand %p2358_p2, %p2655_p8 }
 0xf74   : > { %2521 = dma.done.wait (!%p2355_p3), %s1929_s24, 256  }
 0xf75   : > { %2523 = vsyncadd (!%p2355_p3), %s1929_s24, 4294967040  ;;  %s23_s18 = sadd.s32 1, %s2546_s18   ;;  %s3045_s13 = smov %s2530_s14 }
 0xf76   : > { %p20_p5 = scmp.ge.s32.totalorder %s23_s18, 4   ;;  %s3046_s14 = smov %s2534_s15 }
 0xf77   : > { %s3047_s15 = smov %s2661_s26  ;;  %s3048_s16 = smov %s2542_s17 }
 0xf78   : > { %s3049_s17 = smov %s3051_s21  ;;  %22 = sbr.rel (!%p20_p5) target bundleno = 4 (0x4), region = 119 }
 0xf7f   :  { %1934 = vsyncpa [#allocation3], 1 }
 0xf80   :  { %1936 = vsyncpa [#allocation3 + $0x1], 1 }

// kernel: tpu_custom_call.1
= control target key start
LH: loop header
LB: loop body
LE: loop exit
PB: predicated region body
PF: predicated region fallthrough
CT: control target
= control target key end

     0   :  { %15 = vsyncpa [#allocation3], 0  ;;  %s3032_s0 = inlined_call_operand.vmem [shape: bf16[2,16,32], index: 0, kind: input, shape index: {}]   ;;  %s3033_s1 = inlined_call_operand.vmem [shape: bf16[2,8,24], index: 1, kind: input, shape index: {}]   ;;  %s3034_s2 = inlined_call_operand.vmem [shape: bf16[4,32,8], index: 2, kind: input, shape index: {}]   ;;  %s3035_s3 = inlined_call_operand.vmem [shape: f32[4,1,8], index: 3, kind: input, shape index: {}]   ;;  %s3036_s4 = inlined_call_operand.vmem [shape: bf16[4,24,8], index: 4, kind: input, shape index: {}]   ;;  %s3037_s5 = inlined_call_operand.vmem [shape: f32[4,1,8], index: 5, kind: input, shape index: {}]   ;;  %s3038_s6 = inlined_call_operand.vmem [shape: bf16[4,24,8], index: 6, kind: input, shape index: {}]   ;;  %s3039_s7 = inlined_call_operand.vmem [shape: f32[4,1,8], index: 7, kind: input, shape index: {}]   ;;  %s3040_s8 = inlined_call_operand.vmem [shape: bf16[4,8,32], index: 8, kind: input, shape index: {}]   ;;  %s3041_s9 = inlined_call_operand.vmem [shape: f32[1,32], index: 9, kind: input, shape index: {}]   ;;  %s3042_s10 = inlined_call_operand.hbm [shape: f32[2,16,32], index: 10, kind: output, shape index: {}]  }
   0x1   :  { %17 = vsyncpa [#allocation3 + $0x1], 0  ;;  %s2608_s13 = smov 0   ;;  %s2610_s14 = smov 0  }
   0x2   :  { %s2612_s15 = smov 0   ;;  %s2614_s16 = smov 0  }
   0x3   :  { %s2616_s17 = smov 0   ;;  %s2618_s18 = smov 0  }
   0x4 LB: > { %s2004_s19 = sadd.s32 4294967295, %s2546_s18   ;;  %s2005_s20 = sadd.s32 4294967294, %s2546_s18   ;;  %s2546_s18 = sphi %s2618_s18, %s23_s18   ;;  %s2542_s17 = sphi %s2616_s17, %s3049_s17   ;;  %s2538_s16 = sphi %s2614_s16, %s3048_s16   ;;  %s2534_s15 = sphi %s2612_s15, %s3047_s15   ;;  %s2530_s14 = sphi %s2610_s14, %s3046_s14   ;;  %s2526_s13 = sphi %s2608_s13, %s3045_s13  }
   0x5   : > { %s35_s21 = sadd.s32 1, %s2542_s17  ;;  %s266_s22 = sadd.s32 1, %s2534_s15 }
   0x6   : > { %p37_p0 = scmp.ge.s32.totalorder %s35_s21, 2  ;;  %p276_p1 = scmp.ne.s32.totalorder %s2534_s15, %s2530_s14 }
   0x7   : > { %p277_p2 = scmp.eq.s32.totalorder %s2004_s19, 1  ;;  %p282_p3 = scmp.ne.s32.totalorder %s2530_s14, %s2526_s13 }
   0x8   : > { %s3051_s21 = smov (%p37_p0, %s35_s21), 0  ;;  %p283_p5 = scmp.eq.s32.totalorder %s2005_s20, 1 }
   0x9   : > { %p2648_p4 = por %p277_p2, %p276_p1  ;;  %s261_s24 = ssub.s32 %s2542_s17, %s3051_s21 }
   0xa   : > { %p2008_p6 = scmp.ge.s32.totalorder %s2546_s18, 1  ;;  %p264_p7 = scmp.eq.s32.totalorder %s261_s24, 0 }
   0xb   : > { %p2655_p8 = por %p283_p5, %p282_p3  ;;  %p345_p9 = scmp.lt.s32.totalorder %s2546_s18, 3 }
   0xc   : > { %s2661_s26 = scalar_select %p264_p7, %s2534_s15, %s266_s22  }
   0xd   : > { %p346_p10 = pnand %p2008_p6, %p345_p9 }
   0xe   : > { %v2411_v0 = vld [vmem:[%s3036_s4] sm:$0xff] (!%p346_p10)   ;;  %v2548_v1 = vmov (!%p346_p10), 0.0   ;;  %vm506_vm0 = vcmask (!%p346_p10), 1043456   ;;  %v2413_v3 = vld [vmem:[%s3036_s4 + $0x8] ss:$0 sps:$4 sm:$0xff] (!%p346_p10)   ;;  %p392_p11 = scmp.lt.s32.totalorder (!%p346_p10), %s2538_s16, 1 }
   0xf   : > { %349 = sbr.rel (%p346_p10) target bundleno = 3952 (0xf70), region = 60  ;;  %2192 = vmatprep.subr.bf16.mxu1 (!%p346_p10), %v2548_v1  ;;  %2184 = vmatprep.subr.bf16.mxu0 (!%p346_p10), %v2548_v1  ;;  %v2412_v2 = vld [vmem:[%s3034_s2] sm:$0xff] (!%p346_p10)   ;;  %v2414_v4 = vld [vmem:[%s3034_s2 + $0x8] sm:$0xff] (!%p346_p10)   ;;  %v508_v5 = vsel (!%p346_p10), %vm506_vm0, %v2413_v3, 0  ;;  %vm2549_vm1 = vmmov (!%p346_p10), 0   ;;  %vm502_vm2 = vcmask (!%p346_p10), 195584  }
  0x10   : > { %2193 = vmatpush3.bf16.msra.mxu1 (!%p346_p10), %v2411_v0  ;;  %2185 = vmatpush3.bf16.msra.mxu0 (!%p346_p10), %v2412_v2  ;;  %vm438_vm3 = vcmask (!%p346_p10), 261120   ;;  %v2018_v8 = vld [vmem:[%s3037_s5] ss:$0 sm:$0xff] (!%p346_p10)  ;;  %vm614_vm4 = vcmask (!%p346_p10), 64512   ;;  %v2417_v25 = vld [vmem:[%s3038_s6 + $0x8] ss:$0 sps:$4 sm:$0xff] (!%p346_p10)  }
  0x11   : > { %2194 = vmatprep.subr.bf16.mxu1 (!%p346_p10), %v2548_v1  ;;  %2186 = vmatprep.subr.bf16.mxu0 (!%p346_p10), %v2548_v1  ;;  %v2013_v10 = vld [vmem:[%s3035_s3] ss:$0 sm:$0xff] (!%p346_p10)  ;;  %v570_v26 = vsel (!%p346_p10), %vm506_vm0, %v2417_v25, 0  ;;  %v2419_v53 = vld [vmem:[%s3034_s2 + $0x10] sm:$0xff] (!%p346_p10)   ;;  %v2421_v54 = vld [vmem:[%s3034_s2 + $0x18] sm:$0xff] (!%p346_p10)   ;;  %s2123_s12 = sshll.u32 (!%p346_p10), %s2538_s16, 8 }
  0x12   : > { %2196 = vmatprep.mubr.msk.bf16.mxu1 (!%p346_p10), %vm2549_vm1, %v2548_v1  ;;  %2188 = vmatprep.mubr.msk.bf16.mxu0 (!%p346_p10), %vm2549_vm1, %v2548_v1  ;;  %v2416_v24 = vld [vmem:[%s3038_s6] sm:$0xff] (!%p346_p10)   ;;  %v2418_v61 = vld [vmem:[%s3036_s4 + $0xc] sm:$0xff] (!%p346_p10)   ;;  %v2420_v63 = vld [vmem:[%s3036_s4 + $0x14] ss:$0 sps:$4 sm:$0xff] (!%p346_p10)   ;;  %s2550_s28 = smov (!%p346_p10), [#allocation2]  }
  0x13   : > { %v2022_v48 = vld [vmem:[%s3039_s7] ss:$0 sm:$0xff] (!%p346_p10)  ;;  %v825_v0 = vsel (!%p346_p10), %vm506_vm0, %v2420_v63, 0  ;;  %v2422_v25 = vld [vmem:[%s3038_s6 + $0xc] sm:$0xff] (!%p346_p10)   ;;  %s2472_s29 = sshll.u32 (!%p346_p10), %s2550_s28, 4  ;;  %s2473_s29 = int_to_ptr.vmem [resolvable:$false] %s2472_s29 }
  0x14   : > { %2195 = vmatpush3.bf16.msra.mxu1 (!%p346_p10), %v508_v5  ;;  %2187 = vmatpush3.bf16.msra.mxu0 (!%p346_p10), %v2414_v4  ;;  %v2033_v4 = vld [vmem:[%s3035_s3 + $0x1] ss:$0 sm:$0xff] (!%p346_p10) }
  0x15   : > { %2208 = vmatprep.subr.bf16.mxu1 (!%p346_p10), %v2548_v1  ;;  %2200 = vmatprep.subr.bf16.mxu0 (!%p346_p10), %v2548_v1 }
  0x16   : > { %s393_s22 = scalar_select %p392_p11, %s2538_s16, 1 }
  0x18   : > { %s2012_s24 = sshll.u32 %s393_s22, 2  ;;  %s2122_s27 = sshll.u32 %s393_s22, 3 }
  0x19   : > { %s404_s30 = scalar_lea.vmem %s3033_s1, %s2012_s24  ;;  %s399_s19 = scalar_lea.vmem %s3032_s0, %s2122_s27 }
  0x1a   : > { %v2694_v6 = vld [vmem:[%s404_s30] sm:$0xf]  ;;  %s388_s24 = sand.u32 1, %s2530_s14   ;;  %s2980_s22 = scalar_lea.hbm %s3042_s10, %s2123_s12 }
  0x1b   : > { %2197 = vmatmul.mubr.msk.bf16.vlgmr.msra.gmra.mrb[0].mxu1 %vm502_vm2, %v2694_v6  ;;  %v2698_v7 = vld [vmem:[%s399_s19] sm:$0xff]   ;;  %s2009_s27 = sshll.u32 %s388_s24, 4  ;;  %s2986_s16 = scalar_lea.sflag [#allocation3], %s388_s24 }
  0x1c   : > { %2210 = vmatprep.mubr.msk.bf16.mxu1 %vm2549_vm1, %v2548_v1  ;;  %2189 = vmatmul.mubr.msk.bf16.vlgmr.msra.gmra.mrb[0].mxu0 %vm438_vm3, %v2698_v7  ;;  %s390_s30 = scalar_lea.vmem [#allocation2], %s2009_s27  ;;  %s2474_s12 = scalar_lea.vmem %s2473_s29, 512 }
  0x1d   : > { %2204 = vmatprep.mubr.msk.bf16.mxu0 %vm2549_vm1, %v2548_v1  ;;  %2201 = vmatpush3.bf16.msra.mxu0 %v2416_v24  ;;  %s1913_s11 = sshll.u32 %s390_s30, 4  ;;  %s2982_s11 = int_to_ptr.vmem [resolvable:$true] %s1913_s11 }
  0x1e   : > { %2202 = vmatprep.subr.bf16.mxu0 %v2548_v1  ;;  %s2468_s27 = scalar_lea.vmem %s2982_s11, 256  ;;  %p2475_p1 = scmp.lt.s32.totalorder %s2982_s11, %s2473_s29 }
  0x1f   : > { %p2469_p12 = scmp.ne.s32.totalorder %s2982_s11, %s2468_s27  ;;  %p2476_p2 = scmp.lt.s32.totalorder %s2474_s12, %s2468_s27 }
  0x21   : > { %2203 = vmatpush3.bf16.msra.mxu0 %v570_v26  ;;  %v2423_v26 = vld [vmem:[%s3038_s6 + $0x14] ss:$0 sps:$4 sm:$0xff]   ;;  %p2470_p13 = pnand %p2469_p12, %p2648_p4  ;;  %p2477_p3 = por %p2476_p2, %p2475_p1 }
  0x22   : > { %2214 = vmatprep.subr.bf16.mxu0 %v2548_v1 }
  0x23   : > { %p2471_p0 = pneg %p2470_p13 }
  0x24   : > { %2205 = vmatmul.mubr.msk.bf16.vlgmr.msra.gmra.mrb[4].mxu0 %vm502_vm2, %v2694_v6 }
  0x25   : > { %2216 = vmatprep.mubr.msk.bf16.mxu0 %vm2549_vm1, %v2548_v1  ;;  %p2478_p5 = pnand %p2477_p3, %p2471_p0 }
  0xee   : > { %v544_v9 = vpop.f32.mrb[0].mxu1 }
  0xef   : > { %v545_v11 = vadd.f32 %v2018_v8, %v544_v9  ;;  %v2198_v12 = vpop.f32.mrb[1].mxu1  ;;  %v476_v14 = vpop.f32.mrb[0].mxu0 }
  0xf0   : > { %v547_v13 = vpop.f32.mrb[2].mxu1  ;;  %v477_v16 = vadd.f32 %v2013_v10, %v476_v14  ;;  %v2190_v18 = vpop.f32.mrb[1].mxu0 }
  0xf1   : > { %v613_v15 = vpack.c.bf16 %v545_v11, %v545_v11  ;;  %v2199_v17 = vpop.f32.mrb[3].mxu1  ;;  %v479_v19 = vpop.f32.mrb[2].mxu0 }
  0xf2   : > { %v480_v21 = vadd.f32 %v2013_v10, %v479_v19  ;;  %v2191_v22 = vpop.f32.mrb[3].mxu0  ;;  %v2041_v17 = vld [vmem:[%s3037_s5 + $0x1] ss:$0 sm:$0xff] }
  0xf3   : > { %v619_v20 = vsel %vm614_vm4, %v613_v15, 0 }
  0xf4   : > { %2209 = vmatpush3.bf16.xpose.msra.mxu1 %v619_v20  ;;  %v612_v23 = vpack.c.bf16 %v480_v21, %v477_v16 }
  0xf5   : > { %2220 = vmatprep.subr.bf16.mxu1 %v2548_v1 }
  0xf7   : > { %v606_v45 = vpop.f32.mrb[4].mxu0 }
  0xf8   : > { %v2206_v46 = vpop.f32.mrb[5].mxu0  ;;  %v607_v50 = vadd.f32 %v2022_v48, %v606_v45 }
  0xf9   : > { %v609_v47 = vpop.f32.mrb[6].mxu0 }
  0xfa   : > { %v2207_v49 = vpop.f32.mrb[7].mxu0  ;;  %v687_v51 = vpack.c.bf16 %v607_v50, %v607_v50 }
  0xfb   : > { %2211 = vmatmul.mubr.msk.bf16.vlgmr.msra.gmra.mrb[4].mxu1 %vm614_vm4, %v612_v23  ;;  %v2049_v49 = vld [vmem:[%s3039_s7 + $0x1] ss:$0 sm:$0xff] }
  0xfc   : > { %2224 = vmatprep.mubr.msk.bf16.mxu1 %vm2549_vm1, %v2548_v1  ;;  %v692_v52 = vsel %vm506_vm0, %v687_v51, 0  ;;  %2221 = vmatpush3.bf16.msra.mxu1 %v2419_v53 }
  0xfd   : > { %2215 = vmatpush3.bf16.msra.mxu0 %v692_v52  ;;  %2222 = vmatprep.subr.bf16.mxu1 %v2548_v1 }
  0xfe   : > { %2228 = vmatprep.subr.bf16.mxu0 %v2548_v1 }
 0x100   : > { %2223 = vmatpush3.bf16.msra.mxu1 %v2421_v54  ;;  %v2055_v54 = vld [vmem:[%s3040_s8 + $0x4] sm:$0xf] }
 0x101   : > { %2236 = vmatprep.subr.bf16.mxu1 %v2548_v1 }
 0x103   : > { %2225 = vmatmul.mubr.msk.bf16.vlgmr.msra.gmra.mrb[8].mxu1 %vm438_vm3, %v2698_v7 }
 0x104   : > { %2240 = vmatprep.mubr.msk.bf16.mxu1 %vm2549_vm1, %v2548_v1  ;;  %2237 = vmatpush3.bf16.msra.mxu1 %v2422_v25 }
 0x105   : > { %2238 = vmatprep.subr.bf16.mxu1 %v2548_v1 }
 0x1ce   : > { %v655_v27 = vpop.f32.mrb[4].mxu1 }
 0x1cf   : > { %v662_v28 = vmul.f32 0.35355338, %v655_v27  ;;  %v2212_v29 = vpop.f32.mrb[5].mxu1  ;;  %v889_v27 = vsel %vm506_vm0, %v2423_v26, 0 }
 0x1d0   : > { %v658_v30 = vpop.f32.mrb[6].mxu1  ;;  %2239 = vmatpush3.bf16.msra.mxu1 %v889_v27 }
 0x1d1   : > { %v663_v31 = vmul.f32 0.35355338, %v658_v30  ;;  %v2213_v32 = vpop.f32.mrb[7].mxu1  ;;  %v664_v33 = vsel %vm614_vm4, %v662_v28, -inf  ;;  %2250 = vmatprep.subr.bf16.mxu1 %v2548_v1 }
 0x1d2   : > { %665 = vmax.xlane.f32.xlu0 %v664_v33 }
 0x1d3   : > { %v667_v34 = vsel %vm614_vm4, %v663_v31, -inf  ;;  %2241 = vmatmul.mubr.msk.bf16.vlgmr.msra.gmra.mrb[12].mxu1 %vm502_vm2, %v2694_v6 }
 0x1d4   : > { %2252 = vmatprep.mubr.msk.bf16.mxu1 %vm2549_vm1, %v2548_v1 }
 0x1d6   : > { %668 = vmax.xlane.f32.xlu0 %v667_v34  ;;  %v796_v2 = vpop.f32.mrb[8].mxu1 }
 0x1d7   : > { %v2226_v3 = vpop.f32.mrb[9].mxu1  ;;  %v797_v8 = vadd.f32 %v2033_v4, %v796_v2  ;;  %v2424_v2 = vld [vmem:[%s3036_s4 + $0x18] sm:$0xff]  }
 0x1d8   : > { %v799_v5 = vpop.f32.mrb[10].mxu1  ;;  %v2425_v3 = vld [vmem:[%s3036_s4 + $0x20] ss:$0 sps:$4 sm:$0xff]  }
 0x1d9   : > { %v800_v9 = vadd.f32 %v2033_v4, %v799_v5  ;;  %v2227_v10 = vpop.f32.mrb[11].mxu1  ;;  %v1238_v4 = vsel %vm506_vm0, %v2425_v3, 0 }
 0x1da   : > { %v2426_v10 = vld [vmem:[%s3034_s2 + $0x20] sm:$0xff]  }
 0x1db   : > { %v931_v11 = vpack.c.bf16 %v800_v9, %v797_v8 }
 0x25f   : > { %v666_v35 = vpop.xlane.xlu0 %665 }
 0x260   : > { %v670_v36 = vsub.f32 %v662_v28, %v666_v35 }
 0x262   : > { %v672_v37 = vmul.f32 1.442695, %v670_v36 }
 0x263   : > { %v669_v38 = vpop.xlane.xlu0 %668 }
 0x264   : > { %2436 = vpow2.f32 %v672_v37  ;;  %v671_v39 = vsub.f32 %v663_v31, %v669_v38 }
 0x266   : > { %v674_v40 = vmul.f32 1.442695, %v671_v39 }
 0x268   : > { %2438 = vpow2.f32 %v674_v40 }
 0x26e   : > { %v2437_v41 = vpop.eup %2436 }
 0x26f   : > { %v676_v42 = vsel %vm614_vm4, %v2437_v41, 0.0 }
 0x270   : > { %677 = vadd.xlane.f32.xlu1 %v676_v42 }
 0x272   : > { %v2439_v43 = vpop.eup %2438 }
 0x273   : > { %v679_v44 = vsel %vm614_vm4, %v2439_v43, 0.0 }
 0x274   : > { %680 = vadd.xlane.f32.xlu1 %v679_v44 }
 0x2a6   : > { %v925_v46 = vpop.f32.mrb[12].mxu1 }
 0x2a7   : > { %v2242_v47 = vpop.f32.mrb[13].mxu1  ;;  %v926_v51 = vadd.f32 %v2049_v49, %v925_v46 }
 0x2a8   : > { %v928_v48 = vpop.f32.mrb[14].mxu1 }
 0x2a9   : > { %v2243_v50 = vpop.f32.mrb[15].mxu1  ;;  %v1005_v52 = vpack.c.bf16 %v926_v51, %v926_v51 }
 0x2ab   : > { %v1010_v53 = vsel %vm506_vm0, %v1005_v52, 0 }
 0x2ac   : > { %2251 = vmatpush3.bf16.msra.mxu1 %v1010_v53 }
 0x2ad   : > { %2262 = vmatprep.subr.bf16.mxu1 %v2548_v1 }
 0x2fd   : > { %v678_v55 = vpop.xlane.xlu1 %677 }
 0x2fe   : > { %2440 = vrcp.f32 %v678_v55  ;;  %v1060_v55 = vsel %vm506_vm0, %v2055_v54, 0 }
 0x301   : > { %v681_v56 = vpop.xlane.xlu1 %680 }
 0x302   : > { %2442 = vrcp.f32 %v681_v56 }
 0x308   : > { %v2441_v57 = vpop.eup %2440 }
 0x309   : > { %v684_v59 = vmul.f32 %v2441_v57, %v2437_v41 }
 0x30c   : > { %v2443_v58 = vpop.eup %2442 }
 0x30d   : > { %v685_v60 = vmul.f32 %v2443_v58, %v2439_v43 }
 0x30f   : > { %v686_v62 = vpack.c.bf16 %v685_v60, %v684_v59  ;;  %v736_v60 = vld [vmem:[%s3040_s8] sm:$0xf] }
 0x311   : > { %2217 = vmatmul.mubr.msk.bf16.vlgmr.msra.gmra.mrb[8].mxu0 %vm614_vm4, %v686_v62 }
 0x312   : > { %2229 = vmatpush3.bf16.msra.mxu0 %v2418_v61  ;;  %2232 = vmatprep.mubr.msk.bf16.mxu0 %vm2549_vm1, %v2548_v1 }
 0x313   : > { %2230 = vmatprep.subr.bf16.mxu0 %v2548_v1 }
 0x316   : > { %2231 = vmatpush3.bf16.msra.mxu0 %v825_v0  ;;  %v1107_v0 = vsel %vm506_vm0, %v736_v60, 0 }
 0x317   : > { %2244 = vmatprep.subr.bf16.mxu0 %v2548_v1 }
 0x319   : > { %2233 = vmatmul.mubr.msk.bf16.vlgmr.msra.gmra.mrb[12].mxu0 %vm502_vm2, %v2694_v6 }
 0x31a   : > { %2246 = vmatprep.mubr.msk.bf16.mxu0 %vm2549_vm1, %v2548_v1 }
 0x3e4   : > { %v2770_v12 = vpop.f32.mrb[8].mxu0 }
 0x3e5   : > { %v2218_v13 = vpop.f32.mrb[9].mxu0 }
 0x3e6   : > { %v2772_v14 = vpop.f32.mrb[10].mxu0  ;;  %v2427_v13 = vld [vmem:[%s3034_s2 + $0x28] sm:$0xff]  }
 0x3e7   : > { %v735_v15 = vpack.c.bf16 %v2772_v14, %v2770_v12  ;;  %v2219_v16 = vpop.f32.mrb[11].mxu0 }
 0x3ec   : > { %v861_v18 = vpop.f32.mrb[12].mxu0 }
 0x3ed   : > { %v862_v19 = vadd.f32 %v2041_v17, %v861_v18  ;;  %v2234_v20 = vpop.f32.mrb[13].mxu0  ;;  %v2071_v18 = vld [vmem:[%s3037_s5 + $0x2] ss:$0 sm:$0xff] }
 0x3ee   : > { %v864_v21 = vpop.f32.mrb[14].mxu0 }
 0x3ef   : > { %v932_v22 = vpack.c.bf16 %v862_v19, %v862_v19  ;;  %v2235_v23 = vpop.f32.mrb[15].mxu0 }
 0x3f1   : > { %v937_v24 = vsel %vm614_vm4, %v932_v22, 0 }
 0x3f2   : > { %2245 = vmatpush3.bf16.xpose.msra.mxu0 %v937_v24 }
 0x3f3   : > { %2256 = vmatprep.subr.bf16.mxu0 %v2548_v1 }
 0x3f9   : > { %2247 = vmatmul.mubr.msk.bf16.vlgmr.msra.gmra.mrb[16].mxu0 %vm614_vm4, %v931_v11 }
 0x3fa   : > { %2258 = vmatprep.mubr.msk.bf16.mxu0 %vm2549_vm1, %v2548_v1  ;;  %2257 = vmatpush3.bf16.msra.mxu0 %v1060_v55 }
 0x3fb   : > { %2268 = vmatprep.subr.bf16.mxu0 %v2548_v1 }
 0x4cc   : > { %v973_v28 = vpop.f32.mrb[16].mxu0 }
 0x4cd   : > { %v980_v29 = vmul.f32 0.35355338, %v973_v28  ;;  %v2248_v30 = vpop.f32.mrb[17].mxu0 }
 0x4ce   : > { %v976_v31 = vpop.f32.mrb[18].mxu0 }
 0x4cf   : > { %v981_v32 = vmul.f32 0.35355338, %v976_v31  ;;  %v2249_v33 = vpop.f32.mrb[19].mxu0  ;;  %v982_v34 = vsel %vm614_vm4, %v980_v29, -inf }
 0x4d0   : > { %983 = vmax.xlane.f32.xlu0 %v982_v34 }
 0x4d1   : > { %v985_v35 = vsel %vm614_vm4, %v981_v32, -inf }
 0x4d2   : > { %986 = vmax.xlane.f32.xlu1 %v985_v35 }
 0x55d   : > { %v984_v36 = vpop.xlane.xlu0 %983 }
 0x55e   : > { %v988_v37 = vsub.f32 %v980_v29, %v984_v36 }
 0x55f   : > { %v987_v38 = vpop.xlane.xlu1 %986 }
 0x560   : > { %v990_v39 = vmul.f32 1.442695, %v988_v37  ;;  %v989_v40 = vsub.f32 %v981_v32, %v987_v38  ;;  %v2063_v32 = vld [vmem:[%s3035_s3 + $0x2] ss:$0 sm:$0xff] }
 0x562   : > { %2444 = vpow2.f32 %v990_v39  ;;  %v992_v41 = vmul.f32 1.442695, %v989_v40  ;;  %v2428_v40 = vld [vmem:[%s3038_s6 + $0x18] sm:$0xff]  }
 0x564   : > { %2446 = vpow2.f32 %v992_v41  ;;  %v2429_v41 = vld [vmem:[%s3038_s6 + $0x20] ss:$0 sps:$4 sm:$0xff]  }
 0x56c   : > { %v2445_v42 = vpop.eup %2444 }
 0x56d   : > { %v994_v43 = vsel %vm614_vm4, %v2445_v42, 0.0 }
 0x56e   : > { %v2447_v44 = vpop.eup %2446  ;;  %995 = vadd.xlane.f32.xlu0 %v994_v43 }
 0x56f   : > { %v997_v45 = vsel %vm614_vm4, %v2447_v44, 0.0 }
 0x570   : > { %998 = vadd.xlane.f32.xlu1 %v997_v45 }
 0x5fb   : > { %v996_v56 = vpop.xlane.xlu0 %995 }
 0x5fc   : > { %2448 = vrcp.f32 %v996_v56 }
 0x5fd   : > { %v999_v57 = vpop.xlane.xlu1 %998 }
 0x5fe   : > { %2450 = vrcp.f32 %v999_v57 }
 0x606   : > { %v2449_v58 = vpop.eup %2448 }
 0x607   : > { %v1002_v61 = vmul.f32 %v2449_v58, %v2445_v42  ;;  %v1302_v42 = vsel %vm506_vm0, %v2429_v41, 0 }
 0x608   : > { %v2451_v59 = vpop.eup %2450 }
 0x609   : > { %v1003_v62 = vmul.f32 %v2451_v59, %v2447_v44 }
 0x60b   : > { %v1004_v63 = vpack.c.bf16 %v1003_v62, %v1002_v61 }
 0x60d   : > { %2253 = vmatmul.mubr.msk.bf16.vlgmr.msra.gmra.mrb[16].mxu1 %vm614_vm4, %v1004_v63 }
 0x60e   : > { %2263 = vmatpush3.bf16.msra.mxu1 %v1107_v0  ;;  %2264 = vmatprep.mubr.msk.bf16.mxu1 %vm2549_vm1, %v2548_v1  ;;  %v2079_v0 = vld [vmem:[%s3039_s7 + $0x2] ss:$0 sm:$0xff] }
 0x60f   : > { %2276 = vmatprep.subr.bf16.mxu1 %v2548_v1 }
 0x615   : > { %2265 = vmatmul.mubr.msk.bf16.vlgmr.msra.gmra.mrb[20].mxu1 %vm614_vm4, %v735_v15 }
 0x616   : > { %2277 = vmatpush3.bf16.msra.mxu1 %v2424_v2  ;;  %2280 = vmatprep.mubr.msk.bf16.mxu1 %vm2549_vm1, %v2548_v1 }
 0x617   : > { %2278 = vmatprep.subr.bf16.mxu1 %v2548_v1 }
 0x61a   : > { %2279 = vmatpush3.bf16.msra.mxu1 %v1238_v4 }
 0x61b   : > { %2292 = vmatprep.subr.bf16.mxu1 %v2548_v1 }
 0x61d   : > { %2281 = vmatmul.mubr.msk.bf16.vlgmr.msra.gmra.mrb[24].mxu1 %vm502_vm2, %v2694_v6 }
 0x61e   : > { %2294 = vmatprep.mubr.msk.bf16.mxu1 %vm2549_vm1, %v2548_v1 }
 0x6e0   : > { %v1046_v5 = vpop.f32.mrb[16].mxu1 }
 0x6e1   : > { %v2254_v8 = vpop.f32.mrb[17].mxu1 }
 0x6e2   : > { %v1049_v9 = vpop.f32.mrb[18].mxu1  ;;  %v2085_v8 = vld [vmem:[%s3040_s8 + $0x8] sm:$0xf] }
 0x6e3   : > { %v1053_v11 = vpack.c.bf16 %v1049_v9, %v1046_v5  ;;  %v2255_v12 = vpop.f32.mrb[19].mxu1  ;;  %v1473_v9 = vsel %vm506_vm0, %v2085_v8, 0 }
 0x6e5   : > { %2259 = vmatmul.mubr.msk.bf16.vlgmr.msra.gmra.mrb[20].mxu0 %vm614_vm4, %v1053_v11 }
 0x6e6   : > { %2269 = vmatpush3.bf16.msra.mxu0 %v2426_v10  ;;  %2272 = vmatprep.mubr.msk.bf16.mxu0 %vm2549_vm1, %v2548_v1 }
 0x6e7   : > { %2270 = vmatprep.subr.bf16.mxu0 %v2548_v1 }
 0x6e8   : > { %v1143_v14 = vpop.f32.mrb[20].mxu1 }
 0x6e9   : > { %v2266_v15 = vpop.f32.mrb[21].mxu1 }
 0x6ea   : > { %v1146_v16 = vpop.f32.mrb[22].mxu1  ;;  %2271 = vmatpush3.bf16.msra.mxu0 %v2427_v13 }
 0x6eb   : > { %v2267_v17 = vpop.f32.mrb[23].mxu1  ;;  %2284 = vmatprep.subr.bf16.mxu0 %v2548_v1 }
 0x6ec   : > { %v2431_v17 = vld [vmem:[%s3034_s2 + $0x30] sm:$0xff]  }
 0x6ed   : > { %2273 = vmatmul.mubr.msk.bf16.vlgmr.msra.gmra.mrb[24].mxu0 %vm438_vm3, %v2698_v7 }
 0x6ee   : > { %2288 = vmatprep.mubr.msk.bf16.mxu0 %vm2549_vm1, %v2548_v1  ;;  %2285 = vmatpush3.bf16.msra.mxu0 %v2428_v40 }
 0x6ef   : > { %2286 = vmatprep.subr.bf16.mxu0 %v2548_v1 }
 0x6f0   : > { %v1274_v19 = vpop.f32.mrb[24].mxu1 }
 0x6f1   : > { %v1275_v20 = vadd.f32 %v2071_v18, %v1274_v19  ;;  %v2282_v21 = vpop.f32.mrb[25].mxu1  ;;  %v2433_v18 = vld [vmem:[%s3034_s2 + $0x38] sm:$0xff]  }
 0x6f2   : > { %v1277_v22 = vpop.f32.mrb[26].mxu1  ;;  %2287 = vmatpush3.bf16.msra.mxu0 %v1302_v42  ;;  %v2100_v42 = vld [vmem:[%s3037_s5 + $0x3] ss:$0 sm:$0xff] }
 0x6f3   : > { %v1345_v23 = vpack.c.bf16 %v1275_v20, %v1275_v20  ;;  %v2283_v24 = vpop.f32.mrb[27].mxu1  ;;  %2298 = vmatprep.subr.bf16.mxu0 %v2548_v1  ;;  %v2430_v22 = vld [vmem:[%s3036_s4 + $0x24] sm:$0xff]  }
 0x6f5   : > { %v1350_v25 = vsel %vm614_vm4, %v1345_v23, 0  ;;  %2289 = vmatmul.mubr.msk.bf16.vlgmr.msra.gmra.mrb[28].mxu0 %vm502_vm2, %v2694_v6 }
 0x6f6   : > { %2293 = vmatpush3.bf16.xpose.msra.mxu1 %v1350_v25  ;;  %2300 = vmatprep.mubr.msk.bf16.mxu0 %vm2549_vm1, %v2548_v1  ;;  %v2432_v25 = vld [vmem:[%s3036_s4 + $0x2c] ss:$0 sps:$4 sm:$0xff]  }
 0x6f7   : > { %2304 = vmatprep.subr.bf16.mxu1 %v2548_v1 }
 0x7b8   : > { %v1096_v26 = vpop.f32.mrb[20].mxu0 }
 0x7b9   : > { %v2858_v27 = vadd.f32 %v1143_v14, %v1096_v26  ;;  %v2260_v28 = vpop.f32.mrb[21].mxu0 }
 0x7ba   : > { %v1099_v29 = vpop.f32.mrb[22].mxu0 }
 0x7bb   : > { %v2860_v30 = vadd.f32 %v1146_v16, %v1099_v29  ;;  %v2261_v31 = vpop.f32.mrb[23].mxu0  ;;  %v2092_v29 = vld [vmem:[%s3035_s3 + $0x3] ss:$0 sm:$0xff] }
 0x7c0   : > { %v1209_v33 = vpop.f32.mrb[24].mxu0 }
 0x7c1   : > { %v2274_v34 = vpop.f32.mrb[25].mxu0  ;;  %v1210_v36 = vadd.f32 %v2063_v32, %v1209_v33 }
 0x7c2   : > { %v1212_v35 = vpop.f32.mrb[26].mxu0 }
 0x7c3   : > { %v1213_v37 = vadd.f32 %v2063_v32, %v1212_v35  ;;  %v2275_v38 = vpop.f32.mrb[27].mxu0 }
 0x7c5   : > { %v1344_v39 = vpack.c.bf16 %v1213_v37, %v1210_v36 }
 0x7c7   : > { %2295 = vmatmul.mubr.msk.bf16.vlgmr.msra.gmra.mrb[28].mxu1 %vm614_vm4, %v1344_v39 }
 0x7c8   : > { %2306 = vmatprep.mubr.msk.bf16.mxu1 %vm2549_vm1, %v2548_v1  ;;  %v1338_v61 = vpop.f32.mrb[28].mxu0  ;;  %2305 = vmatpush3.bf16.msra.mxu1 %v1473_v9  ;;  %v2108_v9 = vld [vmem:[%s3039_s7 + $0x3] ss:$0 sm:$0xff] }
 0x7c9   : > { %v2290_v62 = vpop.f32.mrb[29].mxu0  ;;  %v1339_v3 = vadd.f32 %v2079_v0, %v1338_v61  ;;  %2318 = vmatprep.subr.bf16.mxu1 %v2548_v1 }
 0x7ca   : > { %v1341_v63 = vpop.f32.mrb[30].mxu0 }
 0x7cb   : > { %v2291_v2 = vpop.f32.mrb[31].mxu0  ;;  %v1418_v4 = vpack.c.bf16 %v1339_v3, %v1339_v3 }
 0x7cd   : > { %v1423_v5 = vsel %vm506_vm0, %v1418_v4, 0 }
 0x7ce   : > { %2299 = vmatpush3.bf16.msra.mxu0 %v1423_v5 }
 0x7cf   : > { %2310 = vmatprep.subr.bf16.mxu0 %v2548_v1 }
 0x89a   : > { %v1386_v43 = vpop.f32.mrb[28].mxu1 }
 0x89b   : > { %v1393_v44 = vmul.f32 0.35355338, %v1386_v43  ;;  %v2296_v45 = vpop.f32.mrb[29].mxu1 }
 0x89c   : > { %v1389_v46 = vpop.f32.mrb[30].mxu1 }
 0x89d   : > { %v1394_v47 = vmul.f32 0.35355338, %v1389_v46  ;;  %v2297_v48 = vpop.f32.mrb[31].mxu1  ;;  %v1395_v49 = vsel %vm614_vm4, %v1393_v44, -inf }
 0x89e   : > { %1396 = vmax.xlane.f32.xlu0 %v1395_v49 }
 0x89f   : > { %v1398_v50 = vsel %vm614_vm4, %v1394_v47, -inf }
 0x8a0   : > { %1399 = vmax.xlane.f32.xlu1 %v1398_v50 }
 0x92b   : > { %v1397_v51 = vpop.xlane.xlu0 %1396 }
 0x92c   : > { %v1401_v52 = vsub.f32 %v1393_v44, %v1397_v51 }
 0x92d   : > { %v1400_v53 = vpop.xlane.xlu1 %1399 }
 0x92e   : > { %v1403_v54 = vmul.f32 1.442695, %v1401_v52  ;;  %v1402_v55 = vsub.f32 %v1394_v47, %v1400_v53 }
 0x930   : > { %2452 = vpow2.f32 %v1403_v54  ;;  %v1405_v56 = vmul.f32 1.442695, %v1402_v55 }
 0x932   : > { %2454 = vpow2.f32 %v1405_v56 }
 0x93a   : > { %v2453_v57 = vpop.eup %2452 }
 0x93b   : > { %v1407_v58 = vsel %vm614_vm4, %v2453_v57, 0.0 }
 0x93c   : > { %v2455_v59 = vpop.eup %2454  ;;  %1408 = vadd.xlane.f32.xlu0 %v1407_v58 }
 0x93d   : > { %v1410_v60 = vsel %vm614_vm4, %v2455_v59, 0.0 }
 0x93e   : > { %1411 = vadd.xlane.f32.xlu1 %v1410_v60 }
 0x9c9   : > { %v1409_v10 = vpop.xlane.xlu0 %1408 }
 0x9ca   : > { %2456 = vrcp.f32 %v1409_v10 }
 0x9cb   : > { %v1412_v11 = vpop.xlane.xlu1 %1411 }
 0x9cc   : > { %2458 = vrcp.f32 %v1412_v11 }
 0x9d4   : > { %v2457_v12 = vpop.eup %2456 }
 0x9d5   : > { %v1415_v14 = vmul.f32 %v2457_v12, %v2453_v57 }
 0x9d6   : > { %v2459_v13 = vpop.eup %2458 }
 0x9d7   : > { %v1416_v15 = vmul.f32 %v2459_v13, %v2455_v59 }
 0x9d9   : > { %v1417_v16 = vpack.c.bf16 %v1416_v15, %v1415_v14  ;;  %v2114_v14 = vld [vmem:[%s3040_s8 + $0xc] sm:$0xf] }
 0x9da   : > { %v1841_v15 = vsel %vm506_vm0, %v2114_v14, 0 }
 0x9db   : > { %2301 = vmatmul.mubr.msk.bf16.vlgmr.msra.gmra.mrb[32].mxu0 %vm614_vm4, %v1417_v16 }
 0x9dc   : > { %2314 = vmatprep.mubr.msk.bf16.mxu0 %vm2549_vm1, %v2548_v1  ;;  %2311 = vmatpush3.bf16.msra.mxu0 %v2431_v17 }
 0x9dd   : > { %2312 = vmatprep.subr.bf16.mxu0 %v2548_v1 }
 0x9e0   : > { %2313 = vmatpush3.bf16.msra.mxu0 %v2433_v18 }
 0x9e1   : > { %2326 = vmatprep.subr.bf16.mxu0 %v2548_v1 }
 0x9e3   : > { %2315 = vmatmul.mubr.msk.bf16.vlgmr.msra.gmra.mrb[36].mxu0 %vm438_vm3, %v2698_v7  ;;  %v1606_v7 = vsel %vm506_vm0, %v2432_v25, 0 }
 0x9e4   : > { %2330 = vmatprep.mubr.msk.bf16.mxu0 %vm2549_vm1, %v2548_v1 }
 0xaae   : > { %v1459_v19 = vpop.f32.mrb[32].mxu0 }
 0xaaf   : > { %v2302_v20 = vpop.f32.mrb[33].mxu0 }
 0xab0   : > { %v1462_v21 = vpop.f32.mrb[34].mxu0 }
 0xab1   : > { %v1466_v23 = vpack.c.bf16 %v1462_v21, %v1459_v19  ;;  %v2303_v24 = vpop.f32.mrb[35].mxu0 }
 0xab3   : > { %2307 = vmatmul.mubr.msk.bf16.vlgmr.msra.gmra.mrb[32].mxu1 %vm614_vm4, %v1466_v23 }
 0xab4   : > { %2319 = vmatpush3.bf16.msra.mxu1 %v2430_v22  ;;  %2322 = vmatprep.mubr.msk.bf16.mxu1 %vm2549_vm1, %v2548_v1 }
 0xab5   : > { %2320 = vmatprep.subr.bf16.mxu1 %v2548_v1 }
 0xab6   : > { %v1577_v26 = vpop.f32.mrb[36].mxu0 }
 0xab7   : > { %v2316_v28 = vpop.f32.mrb[37].mxu0  ;;  %v1578_v32 = vadd.f32 %v2092_v29, %v1577_v26 }
 0xab8   : > { %2321 = vmatpush3.bf16.msra.mxu1 %v1606_v7  ;;  %v1580_v31 = vpop.f32.mrb[38].mxu0 }
 0xab9   : > { %2334 = vmatprep.subr.bf16.mxu1 %v2548_v1  ;;  %v1581_v33 = vadd.f32 %v2092_v29, %v1580_v31  ;;  %v2317_v34 = vpop.f32.mrb[39].mxu0  ;;  %v2116_v29 = vld [vmem:[%s3041_s9] ss:$0 sm:$0xff] }
 0xabb   : > { %2323 = vmatmul.mubr.msk.bf16.vlgmr.msra.gmra.mrb[36].mxu1 %vm502_vm2, %v2694_v6  ;;  %v1712_v35 = vpack.c.bf16 %v1581_v33, %v1578_v32 }
 0xabc   : > { %2336 = vmatprep.mubr.msk.bf16.mxu1 %vm2549_vm1, %v2548_v1 }
 0xb86   : > { %v1509_v36 = vpop.f32.mrb[32].mxu1 }
 0xb87   : > { %v2930_v37 = vadd.f32 %v1509_v36, %v2858_v27  ;;  %v2308_v38 = vpop.f32.mrb[33].mxu1  ;;  %v2434_v27 = vld [vmem:[%s3038_s6 + $0x24] sm:$0xff]  }
 0xb88   : > { %v1512_v39 = vpop.f32.mrb[34].mxu1  ;;  %2327 = vmatpush3.bf16.msra.mxu0 %v2434_v27 }
 0xb89   : > { %v2933_v40 = vadd.f32 %v1512_v39, %v2860_v30  ;;  %v2309_v41 = vpop.f32.mrb[35].mxu1  ;;  %v2435_v30 = vld [vmem:[%s3038_s6 + $0x2c] ss:$0 sps:$4 sm:$0xff]   ;;  %2328 = vmatprep.subr.bf16.mxu0 %v2548_v1 }
 0xb8a   : > { %v1670_v50 = vsel %vm506_vm0, %v2435_v30, 0 }
 0xb8c   : > { %2329 = vmatpush3.bf16.msra.mxu0 %v1670_v50 }
 0xb8d   : > { %2340 = vmatprep.subr.bf16.mxu0 %v2548_v1 }
 0xb8e   : > { %v1642_v43 = vpop.f32.mrb[36].mxu1 }
 0xb8f   : > { %v1643_v44 = vadd.f32 %v2100_v42, %v1642_v43  ;;  %v2324_v45 = vpop.f32.mrb[37].mxu1  ;;  %2331 = vmatmul.mubr.msk.bf16.vlgmr.msra.gmra.mrb[40].mxu0 %vm502_vm2, %v2694_v6 }
 0xb90   : > { %v1645_v46 = vpop.f32.mrb[38].mxu1  ;;  %2342 = vmatprep.mubr.msk.bf16.mxu0 %vm2549_vm1, %v2548_v1 }
 0xb91   : > { %v1713_v47 = vpack.c.bf16 %v1643_v44, %v1643_v44  ;;  %v2325_v48 = vpop.f32.mrb[39].mxu1 }
 0xb93   : > { %v1718_v49 = vsel %vm614_vm4, %v1713_v47, 0 }
 0xb94   : > { %2335 = vmatpush3.bf16.xpose.msra.mxu1 %v1718_v49 }
 0xb95   : > { %2346 = vmatprep.subr.bf16.mxu1 %v2548_v1 }
 0xb9b   : > { %2337 = vmatmul.mubr.msk.bf16.vlgmr.msra.gmra.mrb[40].mxu1 %vm614_vm4, %v1712_v35 }
 0xb9c   : > { %2348 = vmatprep.mubr.msk.bf16.mxu1 %vm2549_vm1, %v2548_v1  ;;  %2347 = vmatpush3.bf16.msra.mxu1 %v1841_v15 }
 0xc62   : > { %v1706_v4 = vpop.f32.mrb[40].mxu0 }
 0xc63   : > { %v2332_v5 = vpop.f32.mrb[41].mxu0  ;;  %v1707_v11 = vadd.f32 %v2108_v9, %v1706_v4 }
 0xc64   : > { %v1709_v8 = vpop.f32.mrb[42].mxu0 }
 0xc65   : > { %v2333_v10 = vpop.f32.mrb[43].mxu0  ;;  %v1786_v12 = vpack.c.bf16 %v1707_v11, %v1707_v11 }
 0xc67   : > { %v1791_v13 = vsel %vm506_vm0, %v1786_v12, 0 }
 0xc68   : > { %2341 = vmatpush3.bf16.msra.mxu0 %v1791_v13 }
 0xc6e   : > { %v1754_v51 = vpop.f32.mrb[40].mxu1 }
 0xc6f   : > { %v1761_v52 = vmul.f32 0.35355338, %v1754_v51  ;;  %v2338_v53 = vpop.f32.mrb[41].mxu1 }
 0xc70   : > { %v1757_v54 = vpop.f32.mrb[42].mxu1 }
 0xc71   : > { %v1762_v55 = vmul.f32 0.35355338, %v1757_v54  ;;  %v2339_v56 = vpop.f32.mrb[43].mxu1  ;;  %v1763_v57 = vsel %vm614_vm4, %v1761_v52, -inf }
 0xc72   : > { %1764 = vmax.xlane.f32.xlu0 %v1763_v57 }
 0xc73   : > { %v1766_v58 = vsel %vm614_vm4, %v1762_v55, -inf }
 0xc74   : > { %1767 = vmax.xlane.f32.xlu1 %v1766_v58 }
 0xcff   : > { %v1765_v59 = vpop.xlane.xlu0 %1764 }
 0xd00   : > { %v1769_v60 = vsub.f32 %v1761_v52, %v1765_v59 }
 0xd01   : > { %v1768_v61 = vpop.xlane.xlu1 %1767 }
 0xd02   : > { %v1771_v62 = vmul.f32 1.442695, %v1769_v60  ;;  %v1770_v6 = vsub.f32 %v1762_v55, %v1768_v61 }
 0xd04   : > { %2460 = vpow2.f32 %v1771_v62  ;;  %v1773_v63 = vmul.f32 1.442695, %v1770_v6 }
 0xd06   : > { %2462 = vpow2.f32 %v1773_v63 }
 0xd0e   : > { %v2461_v1 = vpop.eup %2460 }
 0xd0f   : > { %v1775_v0 = vsel %vm614_vm4, %v2461_v1, 0.0 }
 0xd10   : > { %v2463_v2 = vpop.eup %2462  ;;  %1776 = vadd.xlane.f32.xlu0 %v1775_v0 }
 0xd11   : > { %v1778_v3 = vsel %vm614_vm4, %v2463_v2, 0.0 }
 0xd12   : > { %1779 = vadd.xlane.f32.xlu1 %v1778_v3 }
 0xd9d   : > { %v1777_v16 = vpop.xlane.xlu0 %1776 }
 0xd9e   : > { %2464 = vrcp.f32 %v1777_v16 }
 0xd9f   : > { %v1780_v17 = vpop.xlane.xlu1 %1779 }
 0xda0   : > { %2466 = vrcp.f32 %v1780_v17 }
 0xda8   : > { %v2465_v18 = vpop.eup %2464 }
 0xda9   : > { %v1783_v20 = vmul.f32 %v2465_v18, %v2461_v1 }
 0xdaa   : > { %v2467_v19 = vpop.eup %2466 }
 0xdab   : > { %v1784_v21 = vmul.f32 %v2467_v19, %v2463_v2 }
 0xdad   : > { %v1785_v22 = vpack.c.bf16 %v1784_v21, %v1783_v20 }
 0xdaf   : > { %2343 = vmatmul.mubr.msk.bf16.vlgmr.msra.gmra.mrb[44].mxu0 %vm614_vm4, %v1785_v22 }
 0xe82   : > { %v1827_v23 = vpop.f32.mrb[44].mxu0 }
 0xe83   : > { %v2344_v24 = vpop.f32.mrb[45].mxu0 }
 0xe84   : > { %v1830_v25 = vpop.f32.mrb[46].mxu0 }
 0xe85   : > { %v1834_v7 = vpack.c.bf16 %v1830_v25, %v1827_v23  ;;  %v2345_v26 = vpop.f32.mrb[47].mxu0 }
 0xe87   : > { %2349 = vmatmul.mubr.msk.bf16.vlgmr.msra.gmra.mrb[44].mxu1 %vm614_vm4, %v1834_v7 }
 0xf5a   : > { %v1877_v28 = vpop.f32.mrb[44].mxu1 }
 0xf5b   : > { %v1884_v31 = vadd.f32 %v1877_v28, %v2930_v37  ;;  %v2350_v32 = vpop.f32.mrb[45].mxu1 }
 0xf5c   : > { %v1880_v33 = vpop.f32.mrb[46].mxu1 }
 0xf5d   : > { %v1893_v34 = vadd.f32 %v2116_v29, %v1884_v31  ;;  %v1885_v35 = vadd.f32 %v1880_v33, %v2933_v40  ;;  %v2351_v36 = vpop.f32.mrb[47].mxu1 }
 0xf5f   : > { %1895 = vst.msk [vmem:[%s390_s30] sm:$0xff] %vm438_vm3, %v1893_v34  ;;  %v1894_v37 = vadd.f32 %v2116_v29, %v1885_v35 }
 0xf61   : > { %1896 = vst.msk [vmem:[%s390_s30 + $0x8] sm:$0xff] %vm438_vm3, %v1894_v37 }
 0xf62   : > { %2481 = shalt.err (!%p2478_p5)
}
 0xf63   : > { %s2482_s24 = scalar_lea.hbm %s2980_s22, 256  ;;  %s2486_s20 = scalar_lea.hbm %s3042_s10, 512 }
 0xf64   : > { %p2483_p6 = scmp.ne.s32.totalorder %s2980_s22, %s2482_s24  ;;  %p2487_p10 = scmp.lt.u32.totalorder %s2980_s22, %s3042_s10 }
 0xf65   : > { %p2488_p11 = scmp.lt.u32.totalorder %s2486_s20, %s2482_s24  ;;  %p2490_p13 = scmp.lt.u32.totalorder %s2482_s24, %s2980_s22 }
 0xf66   : > { %p2484_p7 = pnand %p2483_p6, %p2648_p4 }
 0xf67   : > { %p2489_p12 = por %p2488_p11, %p2487_p10 }
 0xf68   : > { %p2485_p9 = pneg %p2484_p7 }
 0xf69   : > { %p2491_p0 = por %p2490_p13, %p2489_p12 }
 0xf6b   : > { %p2492_p1 = pnand %p2491_p0, %p2485_p9 }
 0xf6d   : > { %2495 = shalt.err (!%p2492_p1)
}
 0xf6e   : > { %s2551_s27 = smov 128   ;;  %s2552_s12 = smov 8  }
 0xf6f   : > { %2352 = dma.vmem_to_hbm [thread:$0]  (%p2648_p4), %s2982_s11, 256, %s2980_s22, %s2986_s16, %s2551_s27, %s2551_s27, %s2552_s12  }
 0xf70 PF: > { %p2358_p2 = scmp.ge.s32.totalorder %s2546_s18, 2  ;;  %s1928_s30 = sand.u32 1, %s2526_s13  }
 0xf71   : > { %s1929_s24 = scalar_lea.sflag [#allocation3], %s1928_s30 }
 0xf72   : > { %p2355_p3 = pnand %p2358_p2, %p2655_p8 }
 0xf74   : > { %2521 = dma.done.wait (!%p2355_p3), %s1929_s24, 256  }
 0xf75   : > { %2523 = vsyncadd (!%p2355_p3), %s1929_s24, 4294967040  ;;  %s23_s18 = sadd.s32 1, %s2546_s18   ;;  %s3045_s13 = smov %s2530_s14 }
 0xf76   : > { %p20_p5 = scmp.ge.s32.totalorder %s23_s18, 4   ;;  %s3046_s14 = smov %s2534_s15 }
 0xf77   : > { %s3047_s15 = smov %s2661_s26  ;;  %s3048_s16 = smov %s2542_s17 }
 0xf78   : > { %s3049_s17 = smov %s3051_s21  ;;  %22 = sbr.rel (!%p20_p5) target bundleno = 4 (0x4), region = 119 }
 0xf7f   :  { %1934 = vsyncpa [#allocation3], 1 }
 0xf80   :  { %1936 = vsyncpa [#allocation3 + $0x1], 1 }

</bundles_post_ra>
